<compile_context>
chip_gen: v7x
topology: tpu7x:2x2x1
jax: 0.10.0
libtpu: 0.0.40
codegen_flags: <defaults>
</compile_context>

<pallas_src>
import jax
import jax.numpy as jnp
from jax.experimental import pallas as pl
from jax.experimental.pallas import tpu as pltpu


# ----------------------------------------------------------------------------
# Fused kernel: multi-layer GRU (PyTorch semantics, gates [r, z, n]) + Linear.
#   r = sigmoid(x Wir^T + bir + h Whr^T + bhr)
#   z = sigmoid(x Wiz^T + biz + h Whz^T + bhz)
#   n = tanh  (x Win^T + bin + r * (h Whn^T + bhn))
#   h' = (1 - z) * n + z * h
# ----------------------------------------------------------------------------
def fused_gru_kernel(x_ref, wih_ref, whh_ref, bgi_ref, bhn_ref, lw_ref, lb_ref,
                     o_ref, act_ref, gi_ref):
    """Shapes:
      x_ref   : (T*Bp, H)    time-major, batch-padded inputs (matmul dtype)
      wih_ref : (L, H, 3H)   gate-fused input weights [r|z|n], pre-transposed
      whh_ref : (L, H, 3H)   gate-fused hidden weights [r|z|n], pre-transposed
      bgi_ref : (L, 1, 3H)   bias folded into the input projection
                             (b_ih+b_hh for r,z ; b_ih only for n)   [f32]
      bhn_ref : (L, 1, H)    hidden bias of n gate (inside r*(...))   [f32]
      lw_ref  : (H, C) f32 ; lb_ref : (1, C) f32
      o_ref   : (Bp, C)      logits for the padded batch
      act_ref : (T*Bp, H)    VMEM scratch, inter-layer activations (matmul dt)
      gi_ref  : (T*Bp, 3H)   VMEM scratch, fused input-projection slab (f32)
    """
    TB, H = x_ref.shape
    Bp = o_ref.shape[0]
    T = TB // Bp
    L = wih_ref.shape[0]
    cdt = wih_ref.dtype                       # MXU operand dtype (bf16 / f32)

    h_last = jnp.zeros((Bp, H), jnp.float32)
    for layer in range(L):                    # static; L is small
        # Layer input: layer 0 straight from the kernel input (no VMEM copy),
        # later layers from the activation scratch written by the layer below.
        x_all = x_ref[...] if layer == 0 else act_ref[...]

        # Hoisted, gate-fused input projection: one (T*Bp,H)x(H,3H) matmul.
        gi_ref[...] = (jnp.dot(x_all, wih_ref[layer],
                               preferred_element_type=jnp.float32)
                       + bgi_ref[layer])

        w_hh = whh_ref[layer]                 # (H, 3H) fused [r|z|n]
        b_hn = bhn_ref[layer]                 # (1, H)
        store_outputs = layer < L - 1         # last layer: only h[T-1] used

        def step(t, h):
            off = pl.multiple_of(t * Bp, Bp)  # Bp is a multiple of 8
            gi = gi_ref[pl.ds(off, Bp), :]    # (Bp, 3H) f32
            # Single MXU matmul per timestep on the serial path.
            gh = jnp.dot(h.astype(cdt), w_hh,
                         preferred_element_type=jnp.float32)       # (Bp, 3H)
            r = jax.nn.sigmoid(gi[:, 0:H] + gh[:, 0:H])
            z = jax.nn.sigmoid(gi[:, H:2 * H] + gh[:, H:2 * H])
            n = jnp.tanh(gi[:, 2 * H:] + r * (gh[:, 2 * H:] + b_hn))
            h_new = (1.0 - z) * n + z * h
            if store_outputs:                 # feed the next layer (VMEM)
                act_ref[pl.ds(off, Bp), :] = h_new.astype(act_ref.dtype)
            return h_new

        h0 = jnp.zeros((Bp, H), jnp.float32)
        # Bounded unroll: keeps LLO overlap without blowing vreg live ranges.
        h_last = jax.lax.fori_loop(0, T, step, h0, unroll=min(8, T))

    # ---- linear head on the last timestep's hidden state (f32) -------------
    o_ref[...] = (jnp.dot(h_last, lw_ref[...],
                          preferred_element_type=jnp.float32) + lb_ref[...])


def _fused_forward(x2d, wih, whh, bgi, bhn, lw, lb, Bp):
    TB, H = x2d.shape
    C = lw.shape[1]
    vmem = pltpu.MemorySpace.VMEM

    # Resident VMEM footprint (no grid -> no double-buffering): size the
    # scoped VMEM limit to it with headroom instead of the 16/32 MiB default.
    nbytes = lambda a: a.size * a.dtype.itemsize
    resident = sum(nbytes(a) for a in (x2d, wih, whh, bgi, bhn, lw, lb))
    resident += TB * H * x2d.dtype.itemsize          # act scratch
    resident += TB * 3 * H * 4                       # fused gi slab (f32)
    resident += Bp * C * 4                           # logits
    vmem_limit = int(min(max(2 * resident + (4 << 20), 16 << 20), 96 << 20))
    # TODO(synk): for large T on v7x (64 MiB VMEM/TC), stream x2d / the gi
    # slab in T-chunks (memory_space=pl.ANY + pltpu.emit_pipeline) and split
    # Bp across the 2 TensorCores instead of keeping everything resident.

    return pl.pallas_call(
        fused_gru_kernel,
        out_shape=jax.ShapeDtypeStruct((Bp, C), jnp.float32),
        in_specs=[pl.BlockSpec(memory_space=vmem)] * 7,
        out_specs=pl.BlockSpec(memory_space=vmem),
        scratch_shapes=[pltpu.VMEM((TB, H), x2d.dtype),         # layer acts
                        pltpu.VMEM((TB, 3 * H), jnp.float32)],  # gi slab
        compiler_params=pltpu.CompilerParams(vmem_limit_bytes=vmem_limit),
    )(x2d, wih, whh, bgi, bhn, lw, lb)


# ----------------------------------------------------------------------------
# Forward pass: embedding gather + layout plumbing in JAX, hot path in Pallas.
# ----------------------------------------------------------------------------
@jax.jit
def gru_classifier_forward(tokens, embedding, kparams):
    B, T = tokens.shape
    H = embedding.shape[1]
    cdt = kparams["wih"].dtype
    Bp = max(8, ((B + 7) // 8) * 8)               # pad batch to f32 sublanes
    # Transpose + pad the tiny int32 token matrix BEFORE the gather, so the
    # embedding lookup directly produces the kernel's (T, Bp, H) layout.
    tok = jnp.pad(jnp.transpose(tokens), ((0, 0), (0, Bp - B)))    # (T, Bp)
    x2d = jnp.take(embedding, tok, axis=0).reshape(T * Bp, H).astype(cdt)
    logits_p = _fused_forward(x2d, kparams["wih"], kparams["whh"],
                              kparams["bgi"], kparams["bhn"],
                              kparams["lw"], kparams["lb"], Bp)
    return logits_p[:B]                           # drop batch padding


# ----------------------------------------------------------------------------
# Parameters: PyTorch-style layout + transform into the kernel layout.
# ----------------------------------------------------------------------------
def init_params(key, num_words, hidden, num_layers, num_classes=2):
    keys = jax.random.split(key, 1 + 4 * num_layers + 2)
    it = iter(keys)
    k = 1.0 / jnp.sqrt(jnp.float32(hidden))
    params = {"embedding": jax.random.normal(next(it), (num_words, hidden),
                                             jnp.float32)}
    layers = []
    for _ in range(num_layers):
        w_ih = jax.random.uniform(next(it), (3 * hidden, hidden), jnp.float32, -k, k)
        w_hh = jax.random.uniform(next(it), (3 * hidden, hidden), jnp.float32, -k, k)
        b_ih = jax.random.uniform(next(it), (3 * hidden,), jnp.float32, -k, k)
        b_hh = jax.random.uniform(next(it), (3 * hidden,), jnp.float32, -k, k)
        layers.append((w_ih, w_hh, b_ih, b_hh))
    params["gru"] = layers
    params["lin_w"] = jax.random.uniform(next(it), (num_classes, hidden),
                                         jnp.float32, -k, k)
    params["lin_b"] = jax.random.uniform(next(it), (num_classes,),
                                         jnp.float32, -k, k)
    return params


def prepare_params(params, matmul_dtype=jnp.bfloat16):
    """Rearrange PyTorch-layout GRU params into the gate-fused kernel layout."""
    H = params["embedding"].shape[1]
    wih_l, whh_l, bgi_l, bhn_l = [], [], [], []
    for (w_ih, w_hh, b_ih, b_hh) in params["gru"]:
        # (3H, H) row blocks [Wr; Wz; Wn] -> (H, 3H), transposed so
        # x @ W_fused == [x Wr^T | x Wz^T | x Wn^T].
        wih_l.append(jnp.concatenate(
            [w_ih[g * H:(g + 1) * H, :].T for g in range(3)], axis=1))
        whh_l.append(jnp.concatenate(
            [w_hh[g * H:(g + 1) * H, :].T for g in range(3)], axis=1))
        bi = b_ih.reshape(3, H)
        bh = b_hh.reshape(3, H)
        # r,z: b_ih + b_hh merged into the input-side bias; n keeps only b_in
        # on the input side because b_hn sits inside r * (h Whn^T + b_hn).
        bgi_l.append(jnp.concatenate([bi[0] + bh[0], bi[1] + bh[1], bi[2]])
                     .reshape(1, 3 * H))
        bhn_l.append(bh[2].reshape(1, H))
    return {
        "wih": jnp.stack(wih_l).astype(matmul_dtype),   # (L, H, 3H)
        "whh": jnp.stack(whh_l).astype(matmul_dtype),   # (L, H, 3H)
        "bgi": jnp.stack(bgi_l),                        # (L, 1, 3H) f32
        "bhn": jnp.stack(bhn_l),                        # (L, 1, H)  f32
        "lw": params["lin_w"].T,                        # (H, C)     f32
        "lb": params["lin_b"].reshape(1, -1),           # (1, C)     f32
    }


# ----------------------------------------------------------------------------
# Pure-JAX reference (PyTorch GRUClassifier semantics) for a sanity check.
# ----------------------------------------------------------------------------
def reference_forward(tokens, params):
    emb = jnp.take(params["embedding"], tokens, axis=0)  # (B, T, H)
    x = jnp.transpose(emb, (1, 0, 2))                    # (T, B, H)
    B = tokens.shape[0]
    H = params["embedding"].shape[1]
    for (w_ih, w_hh, b_ih, b_hh) in params["gru"]:
        def cell(h, x_t):
            gi = x_t @ w_ih.T + b_ih
            gh = h @ w_hh.T + b_hh
            i_r, i_z, i_n = jnp.split(gi, 3, axis=-1)
            h_r, h_z, h_n = jnp.split(gh, 3, axis=-1)
            r = jax.nn.sigmoid(i_r + h_r)
            z = jax.nn.sigmoid(i_z + h_z)
            n = jnp.tanh(i_n + r * h_n)
            h_new = (1.0 - z) * n + z * h
            return h_new, h_new
        _, x = jax.lax.scan(cell, jnp.zeros((B, H), jnp.float32), x)
    h_last = x[-1]
    return h_last @ params["lin_w"].T + params["lin_b"]


if __name__ == "__main__":
    NUM_WORDS, HIDDEN, NUM_LAYERS = 100, 32, 2
    B, T = 2, 8

    key = jax.random.PRNGKey(0)
    k_tok, k_par = jax.random.split(key)
    tokens = jax.random.randint(k_tok, (B, T), 0, NUM_WORDS, dtype=jnp.int32)
    params = init_params(k_par, NUM_WORDS, HIDDEN, NUM_LAYERS)

    with jax.default_matmul_precision("highest"):
        ref = reference_forward(tokens, params)

    # 1) f32 MXU-operand path: tight check of the fused-kernel math itself
    #    (expected ~1e-5; small margin for MXU f32 pass rounding).
    kp_f32 = prepare_params(params, matmul_dtype=jnp.float32)
    out_f32 = gru_classifier_forward(tokens, params["embedding"], kp_f32)
    jax.block_until_ready(out_f32)
    assert out_f32.shape == (B, 2) and out_f32.dtype == jnp.float32
    err32 = float(jnp.max(jnp.abs(out_f32 - ref)))
    assert err32 < 2e-3, f"f32 kernel mismatch vs reference: {err32}"

    # 2) bf16 MXU-operand fast path (f32 gate math / carry): tolerance sized
    #    for bf16 operand rounding.
    kp_bf16 = prepare_params(params, matmul_dtype=jnp.bfloat16)
    out_bf16 = gru_classifier_forward(tokens, params["embedding"], kp_bf16)
    jax.block_until_ready(out_bf16)
    assert out_bf16.shape == (B, 2) and out_bf16.dtype == jnp.float32
    err16 = float(jnp.max(jnp.abs(out_bf16 - ref)))
    assert err16 < 2e-2, f"bf16 kernel mismatch vs reference: {err16}"

    print("KERNEL_OK")
</pallas_src>

<mosaic_0001>
module attributes {stable_mosaic.version = 11 : i64} {
  func.func @fused_gru_kernel(%arg0: memref<64x32xf32, #tpu.memory_space<vmem>>, %arg1: memref<2x32x96xf32, #tpu.memory_space<vmem>>, %arg2: memref<2x32x96xf32, #tpu.memory_space<vmem>>, %arg3: memref<2x1x96xf32, #tpu.memory_space<vmem>>, %arg4: memref<2x1x32xf32, #tpu.memory_space<vmem>>, %arg5: memref<32x2xf32, #tpu.memory_space<vmem>>, %arg6: memref<1x2xf32, #tpu.memory_space<vmem>>, %arg7: memref<8x2xf32, #tpu.memory_space<vmem>>, %arg8: memref<64x32xf32, #tpu.memory_space<vmem>>, %arg9: memref<64x96xf32, #tpu.memory_space<vmem>>) attributes {dimension_semantics = [], scalar_prefetch = 0 : i64, scratch_operands = 2 : i64, tpu.core_type = #tpu.core_type<tc>} {
    %c0 = arith.constant 0 : index
    %c0_0 = arith.constant 0 : index
    %0 = vector.load %arg0[%c0, %c0_0] : memref<64x32xf32, #tpu.memory_space<vmem>>, vector<64x32xf32>
    %c0_1 = arith.constant 0 : index
    %c0_2 = arith.constant 0 : index
    %c0_3 = arith.constant 0 : index
    %1 = vector.load %arg1[%c0_1, %c0_2, %c0_3] : memref<2x32x96xf32, #tpu.memory_space<vmem>>, vector<1x32x96xf32>
    %2 = vector.shape_cast %1 : vector<1x32x96xf32> to vector<32x96xf32>
    %cst = arith.constant dense<0.000000e+00> : vector<64x96xf32>
    %3 = tpu.matmul %0, %2, %cst {dimension_numbers = #tpu.dot_dimension_numbers<[1], [0], [0], [1], [0, 0, 1, 1], [], []>} : vector<64x32xf32>, vector<32x96xf32>, vector<64x96xf32> -> vector<64x96xf32>
    %c0_4 = arith.constant 0 : index
    %c0_5 = arith.constant 0 : index
    %c0_6 = arith.constant 0 : index
    %4 = vector.load %arg3[%c0_4, %c0_5, %c0_6] : memref<2x1x96xf32, #tpu.memory_space<vmem>>, vector<1x1x96xf32>
    %5 = vector.shape_cast %4 : vector<1x1x96xf32> to vector<1x96xf32>
    %6 = vector.broadcast %5 : vector<1x96xf32> to vector<64x96xf32>
    %7 = arith.addf %3, %6 : vector<64x96xf32>
    %c0_7 = arith.constant 0 : index
    %c0_8 = arith.constant 0 : index
    %8 = vector.load %arg9[%c0_7, %c0_8] : memref<64x96xf32, #tpu.memory_space<vmem>>, vector<64x96xf32>
    tpu.vector_store %arg9[%c0_7, %c0_8], %7 {strides = array<i32>} : memref<64x96xf32, #tpu.memory_space<vmem>>, vector<64x96xf32>,
    %c0_9 = arith.constant 0 : index
    %c0_10 = arith.constant 0 : index
    %c0_11 = arith.constant 0 : index
    %9 = vector.load %arg2[%c0_9, %c0_10, %c0_11] : memref<2x32x96xf32, #tpu.memory_space<vmem>>, vector<1x32x96xf32>
    %10 = vector.shape_cast %9 : vector<1x32x96xf32> to vector<32x96xf32>
    %c0_12 = arith.constant 0 : index
    %c0_13 = arith.constant 0 : index
    %c0_14 = arith.constant 0 : index
    %11 = vector.load %arg4[%c0_12, %c0_13, %c0_14] : memref<2x1x32xf32, #tpu.memory_space<vmem>>, vector<1x1x32xf32>
    %12 = vector.shape_cast %11 : vector<1x1x32xf32> to vector<1x32xf32>
    %cst_15 = arith.constant 0.000000e+00 : f32
    %13 = vector.broadcast %cst_15 : f32 to vector<8x32xf32>
    %c0_i32 = arith.constant 0 : i32
    %c8_i32 = arith.constant 8 : i32
    %14 = arith.muli %c0_i32, %c8_i32 : i32
    %15 = tpu.assume_multiple %14, 8 : i32
    %16 = arith.index_cast %15 : i32 to index
    %c0_16 = arith.constant 0 : index
    %17 = vector.load %arg9[%16, %c0_16] : memref<64x96xf32, #tpu.memory_space<vmem>>, vector<8x96xf32>
    %cst_17 = arith.constant dense<0.000000e+00> : vector<8x96xf32>
    %18 = tpu.matmul %13, %10, %cst_17 {dimension_numbers = #tpu.dot_dimension_numbers<[1], [0], [0], [1], [0, 0, 1, 1], [], []>} : vector<8x32xf32>, vector<32x96xf32>, vector<8x96xf32> -> vector<8x96xf32>
    %19 = vector.extract_strided_slice %17 {offsets = [0, 0], sizes = [8, 32], strides = [1, 1]} : vector<8x96xf32> to vector<8x32xf32>
    %20 = vector.extract_strided_slice %18 {offsets = [0, 0], sizes = [8, 32], strides = [1, 1]} : vector<8x96xf32> to vector<8x32xf32>
    %21 = arith.addf %19, %20 : vector<8x32xf32>
    %22 = arith.negf %21 : vector<8x32xf32>
    %23 = math.exp %22 : vector<8x32xf32>
    %cst_18 = arith.constant 1.000000e+00 : f32
    %24 = vector.broadcast %cst_18 : f32 to vector<8x32xf32>
    %25 = arith.addf %24, %23 : vector<8x32xf32>
    %26 = arith.divf %24, %25 : vector<8x32xf32>
    %27 = vector.extract_strided_slice %17 {offsets = [0, 32], sizes = [8, 32], strides = [1, 1]} : vector<8x96xf32> to vector<8x32xf32>
    %28 = vector.extract_strided_slice %18 {offsets = [0, 32], sizes = [8, 32], strides = [1, 1]} : vector<8x96xf32> to vector<8x32xf32>
    %29 = arith.addf %27, %28 : vector<8x32xf32>
    %30 = arith.negf %29 : vector<8x32xf32>
    %31 = math.exp %30 : vector<8x32xf32>
    %cst_19 = arith.constant 1.000000e+00 : f32
    %32 = vector.broadcast %cst_19 : f32 to vector<8x32xf32>
    %33 = arith.addf %32, %31 : vector<8x32xf32>
    %34 = arith.divf %32, %33 : vector<8x32xf32>
    %35 = vector.extract_strided_slice %17 {offsets = [0, 64], sizes = [8, 32], strides = [1, 1]} : vector<8x96xf32> to vector<8x32xf32>
    %36 = vector.extract_strided_slice %18 {offsets = [0, 64], sizes = [8, 32], strides = [1, 1]} : vector<8x96xf32> to vector<8x32xf32>
    %37 = vector.broadcast %12 : vector<1x32xf32> to vector<8x32xf32>
    %38 = arith.addf %36, %37 : vector<8x32xf32>
    %39 = arith.mulf %26, %38 : vector<8x32xf32>
    %40 = arith.addf %35, %39 : vector<8x32xf32>
    %41 = math.tanh %40 : vector<8x32xf32>
    %cst_20 = arith.constant 1.000000e+00 : f32
    %42 = vector.broadcast %cst_20 : f32 to vector<8x32xf32>
    %43 = arith.subf %42, %34 : vector<8x32xf32>
    %44 = arith.mulf %43, %41 : vector<8x32xf32>
    %45 = arith.mulf %34, %13 : vector<8x32xf32>
    %46 = arith.addf %44, %45 : vector<8x32xf32>
    %47 = arith.index_cast %15 : i32 to index
    %c0_21 = arith.constant 0 : index
    %48 = vector.load %arg8[%47, %c0_21] : memref<64x32xf32, #tpu.memory_space<vmem>>, vector<8x32xf32>
    tpu.vector_store %arg8[%47, %c0_21], %46 {strides = array<i32>} : memref<64x32xf32, #tpu.memory_space<vmem>>, vector<8x32xf32>,
    %c1_i32 = arith.constant 1 : i32
    %c8_i32_22 = arith.constant 8 : i32
    %49 = arith.muli %c1_i32, %c8_i32_22 : i32
    %50 = tpu.assume_multiple %49, 8 : i32
    %51 = arith.index_cast %50 : i32 to index
    %c0_23 = arith.constant 0 : index
    %52 = vector.load %arg9[%51, %c0_23] : memref<64x96xf32, #tpu.memory_space<vmem>>, vector<8x96xf32>
    %cst_24 = arith.constant dense<0.000000e+00> : vector<8x96xf32>
    %53 = tpu.matmul %46, %10, %cst_24 {dimension_numbers = #tpu.dot_dimension_numbers<[1], [0], [0], [1], [0, 0, 1, 1], [], []>} : vector<8x32xf32>, vector<32x96xf32>, vector<8x96xf32> -> vector<8x96xf32>
    %54 = vector.extract_strided_slice %52 {offsets = [0, 0], sizes = [8, 32], strides = [1, 1]} : vector<8x96xf32> to vector<8x32xf32>
    %55 = vector.extract_strided_slice %53 {offsets = [0, 0], sizes = [8, 32], strides = [1, 1]} : vector<8x96xf32> to vector<8x32xf32>
    %56 = arith.addf %54, %55 : vector<8x32xf32>
    %57 = arith.negf %56 : vector<8x32xf32>
    %58 = math.exp %57 : vector<8x32xf32>
    %cst_25 = arith.constant 1.000000e+00 : f32
    %59 = vector.broadcast %cst_25 : f32 to vector<8x32xf32>
    %60 = arith.addf %59, %58 : vector<8x32xf32>
    %61 = arith.divf %59, %60 : vector<8x32xf32>
    %62 = vector.extract_strided_slice %52 {offsets = [0, 32], sizes = [8, 32], strides = [1, 1]} : vector<8x96xf32> to vector<8x32xf32>
    %63 = vector.extract_strided_slice %53 {offsets = [0, 32], sizes = [8, 32], strides = [1, 1]} : vector<8x96xf32> to vector<8x32xf32>
    %64 = arith.addf %62, %63 : vector<8x32xf32>
    %65 = arith.negf %64 : vector<8x32xf32>
    %66 = math.exp %65 : vector<8x32xf32>
    %cst_26 = arith.constant 1.000000e+00 : f32
    %67 = vector.broadcast %cst_26 : f32 to vector<8x32xf32>
    %68 = arith.addf %67, %66 : vector<8x32xf32>
    %69 = arith.divf %67, %68 : vector<8x32xf32>
    %70 = vector.extract_strided_slice %52 {offsets = [0, 64], sizes = [8, 32], strides = [1, 1]} : vector<8x96xf32> to vector<8x32xf32>
    %71 = vector.extract_strided_slice %53 {offsets = [0, 64], sizes = [8, 32], strides = [1, 1]} : vector<8x96xf32> to vector<8x32xf32>
    %72 = vector.broadcast %12 : vector<1x32xf32> to vector<8x32xf32>
    %73 = arith.addf %71, %72 : vector<8x32xf32>
    %74 = arith.mulf %61, %73 : vector<8x32xf32>
    %75 = arith.addf %70, %74 : vector<8x32xf32>
    %76 = math.tanh %75 : vector<8x32xf32>
    %cst_27 = arith.constant 1.000000e+00 : f32
    %77 = vector.broadcast %cst_27 : f32 to vector<8x32xf32>
    %78 = arith.subf %77, %69 : vector<8x32xf32>
    %79 = arith.mulf %78, %76 : vector<8x32xf32>
    %80 = arith.mulf %69, %46 : vector<8x32xf32>
    %81 = arith.addf %79, %80 : vector<8x32xf32>
    %82 = arith.index_cast %50 : i32 to index
    %c0_28 = arith.constant 0 : index
    %83 = vector.load %arg8[%82, %c0_28] : memref<64x32xf32, #tpu.memory_space<vmem>>, vector<8x32xf32>
    tpu.vector_store %arg8[%82, %c0_28], %81 {strides = array<i32>} : memref<64x32xf32, #tpu.memory_space<vmem>>, vector<8x32xf32>,
    %c2_i32 = arith.constant 2 : i32
    %c8_i32_29 = arith.constant 8 : i32
    %84 = arith.muli %c2_i32, %c8_i32_29 : i32
    %85 = tpu.assume_multiple %84, 8 : i32
    %86 = arith.index_cast %85 : i32 to index
    %c0_30 = arith.constant 0 : index
    %87 = vector.load %arg9[%86, %c0_30] : memref<64x96xf32, #tpu.memory_space<vmem>>, vector<8x96xf32>
    %cst_31 = arith.constant dense<0.000000e+00> : vector<8x96xf32>
    %88 = tpu.matmul %81, %10, %cst_31 {dimension_numbers = #tpu.dot_dimension_numbers<[1], [0], [0], [1], [0, 0, 1, 1], [], []>} : vector<8x32xf32>, vector<32x96xf32>, vector<8x96xf32> -> vector<8x96xf32>
    %89 = vector.extract_strided_slice %87 {offsets = [0, 0], sizes = [8, 32], strides = [1, 1]} : vector<8x96xf32> to vector<8x32xf32>
    %90 = vector.extract_strided_slice %88 {offsets = [0, 0], sizes = [8, 32], strides = [1, 1]} : vector<8x96xf32> to vector<8x32xf32>
    %91 = arith.addf %89, %90 : vector<8x32xf32>
    %92 = arith.negf %91 : vector<8x32xf32>
    %93 = math.exp %92 : vector<8x32xf32>
    %cst_32 = arith.constant 1.000000e+00 : f32
    %94 = vector.broadcast %cst_32 : f32 to vector<8x32xf32>
    %95 = arith.addf %94, %93 : vector<8x32xf32>
    %96 = arith.divf %94, %95 : vector<8x32xf32>
    %97 = vector.extract_strided_slice %87 {offsets = [0, 32], sizes = [8, 32], strides = [1, 1]} : vector<8x96xf32> to vector<8x32xf32>
    %98 = vector.extract_strided_slice %88 {offsets = [0, 32], sizes = [8, 32], strides = [1, 1]} : vector<8x96xf32> to vector<8x32xf32>
    %99 = arith.addf %97, %98 : vector<8x32xf32>
    %100 = arith.negf %99 : vector<8x32xf32>
    %101 = math.exp %100 : vector<8x32xf32>
    %cst_33 = arith.constant 1.000000e+00 : f32
    %102 = vector.broadcast %cst_33 : f32 to vector<8x32xf32>
    %103 = arith.addf %102, %101 : vector<8x32xf32>
    %104 = arith.divf %102, %103 : vector<8x32xf32>
    %105 = vector.extract_strided_slice %87 {offsets = [0, 64], sizes = [8, 32], strides = [1, 1]} : vector<8x96xf32> to vector<8x32xf32>
    %106 = vector.extract_strided_slice %88 {offsets = [0, 64], sizes = [8, 32], strides = [1, 1]} : vector<8x96xf32> to vector<8x32xf32>
    %107 = vector.broadcast %12 : vector<1x32xf32> to vector<8x32xf32>
    %108 = arith.addf %106, %107 : vector<8x32xf32>
    %109 = arith.mulf %96, %108 : vector<8x32xf32>
    %110 = arith.addf %105, %109 : vector<8x32xf32>
    %111 = math.tanh %110 : vector<8x32xf32>
    %cst_34 = arith.constant 1.000000e+00 : f32
    %112 = vector.broadcast %cst_34 : f32 to vector<8x32xf32>
    %113 = arith.subf %112, %104 : vector<8x32xf32>
    %114 = arith.mulf %113, %111 : vector<8x32xf32>
    %115 = arith.mulf %104, %81 : vector<8x32xf32>
    %116 = arith.addf %114, %115 : vector<8x32xf32>
    %117 = arith.index_cast %85 : i32 to index
    %c0_35 = arith.constant 0 : index
    %118 = vector.load %arg8[%117, %c0_35] : memref<64x32xf32, #tpu.memory_space<vmem>>, vector<8x32xf32>
    tpu.vector_store %arg8[%117, %c0_35], %116 {strides = array<i32>} : memref<64x32xf32, #tpu.memory_space<vmem>>, vector<8x32xf32>,
    %c3_i32 = arith.constant 3 : i32
    %c8_i32_36 = arith.constant 8 : i32
    %119 = arith.muli %c3_i32, %c8_i32_36 : i32
    %120 = tpu.assume_multiple %119, 8 : i32
    %121 = arith.index_cast %120 : i32 to index
    %c0_37 = arith.constant 0 : index
    %122 = vector.load %arg9[%121, %c0_37] : memref<64x96xf32, #tpu.memory_space<vmem>>, vector<8x96xf32>
    %cst_38 = arith.constant dense<0.000000e+00> : vector<8x96xf32>
    %123 = tpu.matmul %116, %10, %cst_38 {dimension_numbers = #tpu.dot_dimension_numbers<[1], [0], [0], [1], [0, 0, 1, 1], [], []>} : vector<8x32xf32>, vector<32x96xf32>, vector<8x96xf32> -> vector<8x96xf32>
    %124 = vector.extract_strided_slice %122 {offsets = [0, 0], sizes = [8, 32], strides = [1, 1]} : vector<8x96xf32> to vector<8x32xf32>
    %125 = vector.extract_strided_slice %123 {offsets = [0, 0], sizes = [8, 32], strides = [1, 1]} : vector<8x96xf32> to vector<8x32xf32>
    %126 = arith.addf %124, %125 : vector<8x32xf32>
    %127 = arith.negf %126 : vector<8x32xf32>
    %128 = math.exp %127 : vector<8x32xf32>
    %cst_39 = arith.constant 1.000000e+00 : f32
    %129 = vector.broadcast %cst_39 : f32 to vector<8x32xf32>
    %130 = arith.addf %129, %128 : vector<8x32xf32>
    %131 = arith.divf %129, %130 : vector<8x32xf32>
    %132 = vector.extract_strided_slice %122 {offsets = [0, 32], sizes = [8, 32], strides = [1, 1]} : vector<8x96xf32> to vector<8x32xf32>
    %133 = vector.extract_strided_slice %123 {offsets = [0, 32], sizes = [8, 32], strides = [1, 1]} : vector<8x96xf32> to vector<8x32xf32>
    %134 = arith.addf %132, %133 : vector<8x32xf32>
    %135 = arith.negf %134 : vector<8x32xf32>
    %136 = math.exp %135 : vector<8x32xf32>
    %cst_40 = arith.constant 1.000000e+00 : f32
    %137 = vector.broadcast %cst_40 : f32 to vector<8x32xf32>
    %138 = arith.addf %137, %136 : vector<8x32xf32>
    %139 = arith.divf %137, %138 : vector<8x32xf32>
    %140 = vector.extract_strided_slice %122 {offsets = [0, 64], sizes = [8, 32], strides = [1, 1]} : vector<8x96xf32> to vector<8x32xf32>
    %141 = vector.extract_strided_slice %123 {offsets = [0, 64], sizes = [8, 32], strides = [1, 1]} : vector<8x96xf32> to vector<8x32xf32>
    %142 = vector.broadcast %12 : vector<1x32xf32> to vector<8x32xf32>
    %143 = arith.addf %141, %142 : vector<8x32xf32>
    %144 = arith.mulf %131, %143 : vector<8x32xf32>
    %145 = arith.addf %140, %144 : vector<8x32xf32>
    %146 = math.tanh %145 : vector<8x32xf32>
    %cst_41 = arith.constant 1.000000e+00 : f32
    %147 = vector.broadcast %cst_41 : f32 to vector<8x32xf32>
    %148 = arith.subf %147, %139 : vector<8x32xf32>
    %149 = arith.mulf %148, %146 : vector<8x32xf32>
    %150 = arith.mulf %139, %116 : vector<8x32xf32>
    %151 = arith.addf %149, %150 : vector<8x32xf32>
    %152 = arith.index_cast %120 : i32 to index
    %c0_42 = arith.constant 0 : index
    %153 = vector.load %arg8[%152, %c0_42] : memref<64x32xf32, #tpu.memory_space<vmem>>, vector<8x32xf32>
    tpu.vector_store %arg8[%152, %c0_42], %151 {strides = array<i32>} : memref<64x32xf32, #tpu.memory_space<vmem>>, vector<8x32xf32>,
    %c4_i32 = arith.constant 4 : i32
    %c8_i32_43 = arith.constant 8 : i32
    %154 = arith.muli %c4_i32, %c8_i32_43 : i32
    %155 = tpu.assume_multiple %154, 8 : i32
    %156 = arith.index_cast %155 : i32 to index
    %c0_44 = arith.constant 0 : index
    %157 = vector.load %arg9[%156, %c0_44] : memref<64x96xf32, #tpu.memory_space<vmem>>, vector<8x96xf32>
    %cst_45 = arith.constant dense<0.000000e+00> : vector<8x96xf32>
    %158 = tpu.matmul %151, %10, %cst_45 {dimension_numbers = #tpu.dot_dimension_numbers<[1], [0], [0], [1], [0, 0, 1, 1], [], []>} : vector<8x32xf32>, vector<32x96xf32>, vector<8x96xf32> -> vector<8x96xf32>
    %159 = vector.extract_strided_slice %157 {offsets = [0, 0], sizes = [8, 32], strides = [1, 1]} : vector<8x96xf32> to vector<8x32xf32>
    %160 = vector.extract_strided_slice %158 {offsets = [0, 0], sizes = [8, 32], strides = [1, 1]} : vector<8x96xf32> to vector<8x32xf32>
    %161 = arith.addf %159, %160 : vector<8x32xf32>
    %162 = arith.negf %161 : vector<8x32xf32>
    %163 = math.exp %162 : vector<8x32xf32>
    %cst_46 = arith.constant 1.000000e+00 : f32
    %164 = vector.broadcast %cst_46 : f32 to vector<8x32xf32>
    %165 = arith.addf %164, %163 : vector<8x32xf32>
    %166 = arith.divf %164, %165 : vector<8x32xf32>
    %167 = vector.extract_strided_slice %157 {offsets = [0, 32], sizes = [8, 32], strides = [1, 1]} : vector<8x96xf32> to vector<8x32xf32>
    %168 = vector.extract_strided_slice %158 {offsets = [0, 32], sizes = [8, 32], strides = [1, 1]} : vector<8x96xf32> to vector<8x32xf32>
    %169 = arith.addf %167, %168 : vector<8x32xf32>
    %170 = arith.negf %169 : vector<8x32xf32>
    %171 = math.exp %170 : vector<8x32xf32>
    %cst_47 = arith.constant 1.000000e+00 : f32
    %172 = vector.broadcast %cst_47 : f32 to vector<8x32xf32>
    %173 = arith.addf %172, %171 : vector<8x32xf32>
    %174 = arith.divf %172, %173 : vector<8x32xf32>
    %175 = vector.extract_strided_slice %157 {offsets = [0, 64], sizes = [8, 32], strides = [1, 1]} : vector<8x96xf32> to vector<8x32xf32>
    %176 = vector.extract_strided_slice %158 {offsets = [0, 64], sizes = [8, 32], strides = [1, 1]} : vector<8x96xf32> to vector<8x32xf32>
    %177 = vector.broadcast %12 : vector<1x32xf32> to vector<8x32xf32>
    %178 = arith.addf %176, %177 : vector<8x32xf32>
    %179 = arith.mulf %166, %178 : vector<8x32xf32>
    %180 = arith.addf %175, %179 : vector<8x32xf32>
    %181 = math.tanh %180 : vector<8x32xf32>
    %cst_48 = arith.constant 1.000000e+00 : f32
    %182 = vector.broadcast %cst_48 : f32 to vector<8x32xf32>
    %183 = arith.subf %182, %174 : vector<8x32xf32>
    %184 = arith.mulf %183, %181 : vector<8x32xf32>
    %185 = arith.mulf %174, %151 : vector<8x32xf32>
    %186 = arith.addf %184, %185 : vector<8x32xf32>
    %187 = arith.index_cast %155 : i32 to index
    %c0_49 = arith.constant 0 : index
    %188 = vector.load %arg8[%187, %c0_49] : memref<64x32xf32, #tpu.memory_space<vmem>>, vector<8x32xf32>
    tpu.vector_store %arg8[%187, %c0_49], %186 {strides = array<i32>} : memref<64x32xf32, #tpu.memory_space<vmem>>, vector<8x32xf32>,
    %c5_i32 = arith.constant 5 : i32
    %c8_i32_50 = arith.constant 8 : i32
    %189 = arith.muli %c5_i32, %c8_i32_50 : i32
    %190 = tpu.assume_multiple %189, 8 : i32
    %191 = arith.index_cast %190 : i32 to index
    %c0_51 = arith.constant 0 : index
    %192 = vector.load %arg9[%191, %c0_51] : memref<64x96xf32, #tpu.memory_space<vmem>>, vector<8x96xf32>
    %cst_52 = arith.constant dense<0.000000e+00> : vector<8x96xf32>
    %193 = tpu.matmul %186, %10, %cst_52 {dimension_numbers = #tpu.dot_dimension_numbers<[1], [0], [0], [1], [0, 0, 1, 1], [], []>} : vector<8x32xf32>, vector<32x96xf32>, vector<8x96xf32> -> vector<8x96xf32>
    %194 = vector.extract_strided_slice %192 {offsets = [0, 0], sizes = [8, 32], strides = [1, 1]} : vector<8x96xf32> to vector<8x32xf32>
    %195 = vector.extract_strided_slice %193 {offsets = [0, 0], sizes = [8, 32], strides = [1, 1]} : vector<8x96xf32> to vector<8x32xf32>
    %196 = arith.addf %194, %195 : vector<8x32xf32>
    %197 = arith.negf %196 : vector<8x32xf32>
    %198 = math.exp %197 : vector<8x32xf32>
    %cst_53 = arith.constant 1.000000e+00 : f32
    %199 = vector.broadcast %cst_53 : f32 to vector<8x32xf32>
    %200 = arith.addf %199, %198 : vector<8x32xf32>
    %201 = arith.divf %199, %200 : vector<8x32xf32>
    %202 = vector.extract_strided_slice %192 {offsets = [0, 32], sizes = [8, 32], strides = [1, 1]} : vector<8x96xf32> to vector<8x32xf32>
    %203 = vector.extract_strided_slice %193 {offsets = [0, 32], sizes = [8, 32], strides = [1, 1]} : vector<8x96xf32> to vector<8x32xf32>
    %204 = arith.addf %202, %203 : vector<8x32xf32>
    %205 = arith.negf %204 : vector<8x32xf32>
    %206 = math.exp %205 : vector<8x32xf32>
    %cst_54 = arith.constant 1.000000e+00 : f32
    %207 = vector.broadcast %cst_54 : f32 to vector<8x32xf32>
    %208 = arith.addf %207, %206 : vector<8x32xf32>
    %209 = arith.divf %207, %208 : vector<8x32xf32>
    %210 = vector.extract_strided_slice %192 {offsets = [0, 64], sizes = [8, 32], strides = [1, 1]} : vector<8x96xf32> to vector<8x32xf32>
    %211 = vector.extract_strided_slice %193 {offsets = [0, 64], sizes = [8, 32], strides = [1, 1]} : vector<8x96xf32> to vector<8x32xf32>
    %212 = vector.broadcast %12 : vector<1x32xf32> to vector<8x32xf32>
    %213 = arith.addf %211, %212 : vector<8x32xf32>
    %214 = arith.mulf %201, %213 : vector<8x32xf32>
    %215 = arith.addf %210, %214 : vector<8x32xf32>
    %216 = math.tanh %215 : vector<8x32xf32>
    %cst_55 = arith.constant 1.000000e+00 : f32
    %217 = vector.broadcast %cst_55 : f32 to vector<8x32xf32>
    %218 = arith.subf %217, %209 : vector<8x32xf32>
    %219 = arith.mulf %218, %216 : vector<8x32xf32>
    %220 = arith.mulf %209, %186 : vector<8x32xf32>
    %221 = arith.addf %219, %220 : vector<8x32xf32>
    %222 = arith.index_cast %190 : i32 to index
    %c0_56 = arith.constant 0 : index
    %223 = vector.load %arg8[%222, %c0_56] : memref<64x32xf32, #tpu.memory_space<vmem>>, vector<8x32xf32>
    tpu.vector_store %arg8[%222, %c0_56], %221 {strides = array<i32>} : memref<64x32xf32, #tpu.memory_space<vmem>>, vector<8x32xf32>,
    %c6_i32 = arith.constant 6 : i32
    %c8_i32_57 = arith.constant 8 : i32
    %224 = arith.muli %c6_i32, %c8_i32_57 : i32
    %225 = tpu.assume_multiple %224, 8 : i32
    %226 = arith.index_cast %225 : i32 to index
    %c0_58 = arith.constant 0 : index
    %227 = vector.load %arg9[%226, %c0_58] : memref<64x96xf32, #tpu.memory_space<vmem>>, vector<8x96xf32>
    %cst_59 = arith.constant dense<0.000000e+00> : vector<8x96xf32>
    %228 = tpu.matmul %221, %10, %cst_59 {dimension_numbers = #tpu.dot_dimension_numbers<[1], [0], [0], [1], [0, 0, 1, 1], [], []>} : vector<8x32xf32>, vector<32x96xf32>, vector<8x96xf32> -> vector<8x96xf32>
    %229 = vector.extract_strided_slice %227 {offsets = [0, 0], sizes = [8, 32], strides = [1, 1]} : vector<8x96xf32> to vector<8x32xf32>
    %230 = vector.extract_strided_slice %228 {offsets = [0, 0], sizes = [8, 32], strides = [1, 1]} : vector<8x96xf32> to vector<8x32xf32>
    %231 = arith.addf %229, %230 : vector<8x32xf32>
    %232 = arith.negf %231 : vector<8x32xf32>
    %233 = math.exp %232 : vector<8x32xf32>
    %cst_60 = arith.constant 1.000000e+00 : f32
    %234 = vector.broadcast %cst_60 : f32 to vector<8x32xf32>
    %235 = arith.addf %234, %233 : vector<8x32xf32>
    %236 = arith.divf %234, %235 : vector<8x32xf32>
    %237 = vector.extract_strided_slice %227 {offsets = [0, 32], sizes = [8, 32], strides = [1, 1]} : vector<8x96xf32> to vector<8x32xf32>
    %238 = vector.extract_strided_slice %228 {offsets = [0, 32], sizes = [8, 32], strides = [1, 1]} : vector<8x96xf32> to vector<8x32xf32>
    %239 = arith.addf %237, %238 : vector<8x32xf32>
    %240 = arith.negf %239 : vector<8x32xf32>
    %241 = math.exp %240 : vector<8x32xf32>
    %cst_61 = arith.constant 1.000000e+00 : f32
    %242 = vector.broadcast %cst_61 : f32 to vector<8x32xf32>
    %243 = arith.addf %242, %241 : vector<8x32xf32>
    %244 = arith.divf %242, %243 : vector<8x32xf32>
    %245 = vector.extract_strided_slice %227 {offsets = [0, 64], sizes = [8, 32], strides = [1, 1]} : vector<8x96xf32> to vector<8x32xf32>
    %246 = vector.extract_strided_slice %228 {offsets = [0, 64], sizes = [8, 32], strides = [1, 1]} : vector<8x96xf32> to vector<8x32xf32>
    %247 = vector.broadcast %12 : vector<1x32xf32> to vector<8x32xf32>
    %248 = arith.addf %246, %247 : vector<8x32xf32>
    %249 = arith.mulf %236, %248 : vector<8x32xf32>
    %250 = arith.addf %245, %249 : vector<8x32xf32>
    %251 = math.tanh %250 : vector<8x32xf32>
    %cst_62 = arith.constant 1.000000e+00 : f32
    %252 = vector.broadcast %cst_62 : f32 to vector<8x32xf32>
    %253 = arith.subf %252, %244 : vector<8x32xf32>
    %254 = arith.mulf %253, %251 : vector<8x32xf32>
    %255 = arith.mulf %244, %221 : vector<8x32xf32>
    %256 = arith.addf %254, %255 : vector<8x32xf32>
    %257 = arith.index_cast %225 : i32 to index
    %c0_63 = arith.constant 0 : index
    %258 = vector.load %arg8[%257, %c0_63] : memref<64x32xf32, #tpu.memory_space<vmem>>, vector<8x32xf32>
    tpu.vector_store %arg8[%257, %c0_63], %256 {strides = array<i32>} : memref<64x32xf32, #tpu.memory_space<vmem>>, vector<8x32xf32>,
    %c7_i32 = arith.constant 7 : i32
    %c8_i32_64 = arith.constant 8 : i32
    %259 = arith.muli %c7_i32, %c8_i32_64 : i32
    %260 = tpu.assume_multiple %259, 8 : i32
    %261 = arith.index_cast %260 : i32 to index
    %c0_65 = arith.constant 0 : index
    %262 = vector.load %arg9[%261, %c0_65] : memref<64x96xf32, #tpu.memory_space<vmem>>, vector<8x96xf32>
    %cst_66 = arith.constant dense<0.000000e+00> : vector<8x96xf32>
    %263 = tpu.matmul %256, %10, %cst_66 {dimension_numbers = #tpu.dot_dimension_numbers<[1], [0], [0], [1], [0, 0, 1, 1], [], []>} : vector<8x32xf32>, vector<32x96xf32>, vector<8x96xf32> -> vector<8x96xf32>
    %264 = vector.extract_strided_slice %262 {offsets = [0, 0], sizes = [8, 32], strides = [1, 1]} : vector<8x96xf32> to vector<8x32xf32>
    %265 = vector.extract_strided_slice %263 {offsets = [0, 0], sizes = [8, 32], strides = [1, 1]} : vector<8x96xf32> to vector<8x32xf32>
    %266 = arith.addf %264, %265 : vector<8x32xf32>
    %267 = arith.negf %266 : vector<8x32xf32>
    %268 = math.exp %267 : vector<8x32xf32>
    %cst_67 = arith.constant 1.000000e+00 : f32
    %269 = vector.broadcast %cst_67 : f32 to vector<8x32xf32>
    %270 = arith.addf %269, %268 : vector<8x32xf32>
    %271 = arith.divf %269, %270 : vector<8x32xf32>
    %272 = vector.extract_strided_slice %262 {offsets = [0, 32], sizes = [8, 32], strides = [1, 1]} : vector<8x96xf32> to vector<8x32xf32>
    %273 = vector.extract_strided_slice %263 {offsets = [0, 32], sizes = [8, 32], strides = [1, 1]} : vector<8x96xf32> to vector<8x32xf32>
    %274 = arith.addf %272, %273 : vector<8x32xf32>
    %275 = arith.negf %274 : vector<8x32xf32>
    %276 = math.exp %275 : vector<8x32xf32>
    %cst_68 = arith.constant 1.000000e+00 : f32
    %277 = vector.broadcast %cst_68 : f32 to vector<8x32xf32>
    %278 = arith.addf %277, %276 : vector<8x32xf32>
    %279 = arith.divf %277, %278 : vector<8x32xf32>
    %280 = vector.extract_strided_slice %262 {offsets = [0, 64], sizes = [8, 32], strides = [1, 1]} : vector<8x96xf32> to vector<8x32xf32>
    %281 = vector.extract_strided_slice %263 {offsets = [0, 64], sizes = [8, 32], strides = [1, 1]} : vector<8x96xf32> to vector<8x32xf32>
    %282 = vector.broadcast %12 : vector<1x32xf32> to vector<8x32xf32>
    %283 = arith.addf %281, %282 : vector<8x32xf32>
    %284 = arith.mulf %271, %283 : vector<8x32xf32>
    %285 = arith.addf %280, %284 : vector<8x32xf32>
    %286 = math.tanh %285 : vector<8x32xf32>
    %cst_69 = arith.constant 1.000000e+00 : f32
    %287 = vector.broadcast %cst_69 : f32 to vector<8x32xf32>
    %288 = arith.subf %287, %279 : vector<8x32xf32>
    %289 = arith.mulf %288, %286 : vector<8x32xf32>
    %290 = arith.mulf %279, %256 : vector<8x32xf32>
    %291 = arith.addf %289, %290 : vector<8x32xf32>
    %292 = arith.index_cast %260 : i32 to index
    %c0_70 = arith.constant 0 : index
    %293 = vector.load %arg8[%292, %c0_70] : memref<64x32xf32, #tpu.memory_space<vmem>>, vector<8x32xf32>
    tpu.vector_store %arg8[%292, %c0_70], %291 {strides = array<i32>} : memref<64x32xf32, #tpu.memory_space<vmem>>, vector<8x32xf32>,
    %c8_i32_71 = arith.constant 8 : i32
    %c0_72 = arith.constant 0 : index
    %c0_73 = arith.constant 0 : index
    %294 = vector.load %arg8[%c0_72, %c0_73] : memref<64x32xf32, #tpu.memory_space<vmem>>, vector<64x32xf32>
    %c1 = arith.constant 1 : index
    %c0_74 = arith.constant 0 : index
    %c0_75 = arith.constant 0 : index
    %295 = vector.load %arg1[%c1, %c0_74, %c0_75] : memref<2x32x96xf32, #tpu.memory_space<vmem>>, vector<1x32x96xf32>
    %296 = vector.shape_cast %295 : vector<1x32x96xf32> to vector<32x96xf32>
    %cst_76 = arith.constant dense<0.000000e+00> : vector<64x96xf32>
    %297 = tpu.matmul %294, %296, %cst_76 {dimension_numbers = #tpu.dot_dimension_numbers<[1], [0], [0], [1], [0, 0, 1, 1], [], []>} : vector<64x32xf32>, vector<32x96xf32>, vector<64x96xf32> -> vector<64x96xf32>
    %c1_77 = arith.constant 1 : index
    %c0_78 = arith.constant 0 : index
    %c0_79 = arith.constant 0 : index
    %298 = vector.load %arg3[%c1_77, %c0_78, %c0_79] : memref<2x1x96xf32, #tpu.memory_space<vmem>>, vector<1x1x96xf32>
    %299 = vector.shape_cast %298 : vector<1x1x96xf32> to vector<1x96xf32>
    %300 = vector.broadcast %299 : vector<1x96xf32> to vector<64x96xf32>
    %301 = arith.addf %297, %300 : vector<64x96xf32>
    %c0_80 = arith.constant 0 : index
    %c0_81 = arith.constant 0 : index
    %302 = vector.load %arg9[%c0_80, %c0_81] : memref<64x96xf32, #tpu.memory_space<vmem>>, vector<64x96xf32>
    tpu.vector_store %arg9[%c0_80, %c0_81], %301 {strides = array<i32>} : memref<64x96xf32, #tpu.memory_space<vmem>>, vector<64x96xf32>,
    %c1_82 = arith.constant 1 : index
    %c0_83 = arith.constant 0 : index
    %c0_84 = arith.constant 0 : index
    %303 = vector.load %arg2[%c1_82, %c0_83, %c0_84] : memref<2x32x96xf32, #tpu.memory_space<vmem>>, vector<1x32x96xf32>
    %304 = vector.shape_cast %303 : vector<1x32x96xf32> to vector<32x96xf32>
    %c1_85 = arith.constant 1 : index
    %c0_86 = arith.constant 0 : index
    %c0_87 = arith.constant 0 : index
    %305 = vector.load %arg4[%c1_85, %c0_86, %c0_87] : memref<2x1x32xf32, #tpu.memory_space<vmem>>, vector<1x1x32xf32>
    %306 = vector.shape_cast %305 : vector<1x1x32xf32> to vector<1x32xf32>
    %cst_88 = arith.constant 0.000000e+00 : f32
    %307 = vector.broadcast %cst_88 : f32 to vector<8x32xf32>
    %c0_i32_89 = arith.constant 0 : i32
    %c8_i32_90 = arith.constant 8 : i32
    %308 = arith.muli %c0_i32_89, %c8_i32_90 : i32
    %309 = tpu.assume_multiple %308, 8 : i32
    %310 = arith.index_cast %309 : i32 to index
    %c0_91 = arith.constant 0 : index
    %311 = vector.load %arg9[%310, %c0_91] : memref<64x96xf32, #tpu.memory_space<vmem>>, vector<8x96xf32>
    %cst_92 = arith.constant dense<0.000000e+00> : vector<8x96xf32>
    %312 = tpu.matmul %307, %304, %cst_92 {dimension_numbers = #tpu.dot_dimension_numbers<[1], [0], [0], [1], [0, 0, 1, 1], [], []>} : vector<8x32xf32>, vector<32x96xf32>, vector<8x96xf32> -> vector<8x96xf32>
    %313 = vector.extract_strided_slice %311 {offsets = [0, 0], sizes = [8, 32], strides = [1, 1]} : vector<8x96xf32> to vector<8x32xf32>
    %314 = vector.extract_strided_slice %312 {offsets = [0, 0], sizes = [8, 32], strides = [1, 1]} : vector<8x96xf32> to vector<8x32xf32>
    %315 = arith.addf %313, %314 : vector<8x32xf32>
    %316 = arith.negf %315 : vector<8x32xf32>
    %317 = math.exp %316 : vector<8x32xf32>
    %cst_93 = arith.constant 1.000000e+00 : f32
    %318 = vector.broadcast %cst_93 : f32 to vector<8x32xf32>
    %319 = arith.addf %318, %317 : vector<8x32xf32>
    %320 = arith.divf %318, %319 : vector<8x32xf32>
    %321 = vector.extract_strided_slice %311 {offsets = [0, 32], sizes = [8, 32], strides = [1, 1]} : vector<8x96xf32> to vector<8x32xf32>
    %322 = vector.extract_strided_slice %312 {offsets = [0, 32], sizes = [8, 32], strides = [1, 1]} : vector<8x96xf32> to vector<8x32xf32>
    %323 = arith.addf %321, %322 : vector<8x32xf32>
    %324 = arith.negf %323 : vector<8x32xf32>
    %325 = math.exp %324 : vector<8x32xf32>
    %cst_94 = arith.constant 1.000000e+00 : f32
    %326 = vector.broadcast %cst_94 : f32 to vector<8x32xf32>
    %327 = arith.addf %326, %325 : vector<8x32xf32>
    %328 = arith.divf %326, %327 : vector<8x32xf32>
    %329 = vector.extract_strided_slice %311 {offsets = [0, 64], sizes = [8, 32], strides = [1, 1]} : vector<8x96xf32> to vector<8x32xf32>
    %330 = vector.extract_strided_slice %312 {offsets = [0, 64], sizes = [8, 32], strides = [1, 1]} : vector<8x96xf32> to vector<8x32xf32>
    %331 = vector.broadcast %306 : vector<1x32xf32> to vector<8x32xf32>
    %332 = arith.addf %330, %331 : vector<8x32xf32>
    %333 = arith.mulf %320, %332 : vector<8x32xf32>
    %334 = arith.addf %329, %333 : vector<8x32xf32>
    %335 = math.tanh %334 : vector<8x32xf32>
    %cst_95 = arith.constant 1.000000e+00 : f32
    %336 = vector.broadcast %cst_95 : f32 to vector<8x32xf32>
    %337 = arith.subf %336, %328 : vector<8x32xf32>
    %338 = arith.mulf %337, %335 : vector<8x32xf32>
    %339 = arith.mulf %328, %307 : vector<8x32xf32>
    %340 = arith.addf %338, %339 : vector<8x32xf32>
    %c1_i32_96 = arith.constant 1 : i32
    %c8_i32_97 = arith.constant 8 : i32
    %341 = arith.muli %c1_i32_96, %c8_i32_97 : i32
    %342 = tpu.assume_multiple %341, 8 : i32
    %343 = arith.index_cast %342 : i32 to index
    %c0_98 = arith.constant 0 : index
    %344 = vector.load %arg9[%343, %c0_98] : memref<64x96xf32, #tpu.memory_space<vmem>>, vector<8x96xf32>
    %cst_99 = arith.constant dense<0.000000e+00> : vector<8x96xf32>
    %345 = tpu.matmul %340, %304, %cst_99 {dimension_numbers = #tpu.dot_dimension_numbers<[1], [0], [0], [1], [0, 0, 1, 1], [], []>} : vector<8x32xf32>, vector<32x96xf32>, vector<8x96xf32> -> vector<8x96xf32>
    %346 = vector.extract_strided_slice %344 {offsets = [0, 0], sizes = [8, 32], strides = [1, 1]} : vector<8x96xf32> to vector<8x32xf32>
    %347 = vector.extract_strided_slice %345 {offsets = [0, 0], sizes = [8, 32], strides = [1, 1]} : vector<8x96xf32> to vector<8x32xf32>
    %348 = arith.addf %346, %347 : vector<8x32xf32>
    %349 = arith.negf %348 : vector<8x32xf32>
    %350 = math.exp %349 : vector<8x32xf32>
    %cst_100 = arith.constant 1.000000e+00 : f32
    %351 = vector.broadcast %cst_100 : f32 to vector<8x32xf32>
    %352 = arith.addf %351, %350 : vector<8x32xf32>
    %353 = arith.divf %351, %352 : vector<8x32xf32>
    %354 = vector.extract_strided_slice %344 {offsets = [0, 32], sizes = [8, 32], strides = [1, 1]} : vector<8x96xf32> to vector<8x32xf32>
    %355 = vector.extract_strided_slice %345 {offsets = [0, 32], sizes = [8, 32], strides = [1, 1]} : vector<8x96xf32> to vector<8x32xf32>
    %356 = arith.addf %354, %355 : vector<8x32xf32>
    %357 = arith.negf %356 : vector<8x32xf32>
    %358 = math.exp %357 : vector<8x32xf32>
    %cst_101 = arith.constant 1.000000e+00 : f32
    %359 = vector.broadcast %cst_101 : f32 to vector<8x32xf32>
    %360 = arith.addf %359, %358 : vector<8x32xf32>
    %361 = arith.divf %359, %360 : vector<8x32xf32>
    %362 = vector.extract_strided_slice %344 {offsets = [0, 64], sizes = [8, 32], strides = [1, 1]} : vector<8x96xf32> to vector<8x32xf32>
    %363 = vector.extract_strided_slice %345 {offsets = [0, 64], sizes = [8, 32], strides = [1, 1]} : vector<8x96xf32> to vector<8x32xf32>
    %364 = vector.broadcast %306 : vector<1x32xf32> to vector<8x32xf32>
    %365 = arith.addf %363, %364 : vector<8x32xf32>
    %366 = arith.mulf %353, %365 : vector<8x32xf32>
    %367 = arith.addf %362, %366 : vector<8x32xf32>
    %368 = math.tanh %367 : vector<8x32xf32>
    %cst_102 = arith.constant 1.000000e+00 : f32
    %369 = vector.broadcast %cst_102 : f32 to vector<8x32xf32>
    %370 = arith.subf %369, %361 : vector<8x32xf32>
    %371 = arith.mulf %370, %368 : vector<8x32xf32>
    %372 = arith.mulf %361, %340 : vector<8x32xf32>
    %373 = arith.addf %371, %372 : vector<8x32xf32>
    %c2_i32_103 = arith.constant 2 : i32
    %c8_i32_104 = arith.constant 8 : i32
    %374 = arith.muli %c2_i32_103, %c8_i32_104 : i32
    %375 = tpu.assume_multiple %374, 8 : i32
    %376 = arith.index_cast %375 : i32 to index
    %c0_105 = arith.constant 0 : index
    %377 = vector.load %arg9[%376, %c0_105] : memref<64x96xf32, #tpu.memory_space<vmem>>, vector<8x96xf32>
    %cst_106 = arith.constant dense<0.000000e+00> : vector<8x96xf32>
    %378 = tpu.matmul %373, %304, %cst_106 {dimension_numbers = #tpu.dot_dimension_numbers<[1], [0], [0], [1], [0, 0, 1, 1], [], []>} : vector<8x32xf32>, vector<32x96xf32>, vector<8x96xf32> -> vector<8x96xf32>
    %379 = vector.extract_strided_slice %377 {offsets = [0, 0], sizes = [8, 32], strides = [1, 1]} : vector<8x96xf32> to vector<8x32xf32>
    %380 = vector.extract_strided_slice %378 {offsets = [0, 0], sizes = [8, 32], strides = [1, 1]} : vector<8x96xf32> to vector<8x32xf32>
    %381 = arith.addf %379, %380 : vector<8x32xf32>
    %382 = arith.negf %381 : vector<8x32xf32>
    %383 = math.exp %382 : vector<8x32xf32>
    %cst_107 = arith.constant 1.000000e+00 : f32
    %384 = vector.broadcast %cst_107 : f32 to vector<8x32xf32>
    %385 = arith.addf %384, %383 : vector<8x32xf32>
    %386 = arith.divf %384, %385 : vector<8x32xf32>
    %387 = vector.extract_strided_slice %377 {offsets = [0, 32], sizes = [8, 32], strides = [1, 1]} : vector<8x96xf32> to vector<8x32xf32>
    %388 = vector.extract_strided_slice %378 {offsets = [0, 32], sizes = [8, 32], strides = [1, 1]} : vector<8x96xf32> to vector<8x32xf32>
    %389 = arith.addf %387, %388 : vector<8x32xf32>
    %390 = arith.negf %389 : vector<8x32xf32>
    %391 = math.exp %390 : vector<8x32xf32>
    %cst_108 = arith.constant 1.000000e+00 : f32
    %392 = vector.broadcast %cst_108 : f32 to vector<8x32xf32>
    %393 = arith.addf %392, %391 : vector<8x32xf32>
    %394 = arith.divf %392, %393 : vector<8x32xf32>
    %395 = vector.extract_strided_slice %377 {offsets = [0, 64], sizes = [8, 32], strides = [1, 1]} : vector<8x96xf32> to vector<8x32xf32>
    %396 = vector.extract_strided_slice %378 {offsets = [0, 64], sizes = [8, 32], strides = [1, 1]} : vector<8x96xf32> to vector<8x32xf32>
    %397 = vector.broadcast %306 : vector<1x32xf32> to vector<8x32xf32>
    %398 = arith.addf %396, %397 : vector<8x32xf32>
    %399 = arith.mulf %386, %398 : vector<8x32xf32>
    %400 = arith.addf %395, %399 : vector<8x32xf32>
    %401 = math.tanh %400 : vector<8x32xf32>
    %cst_109 = arith.constant 1.000000e+00 : f32
    %402 = vector.broadcast %cst_109 : f32 to vector<8x32xf32>
    %403 = arith.subf %402, %394 : vector<8x32xf32>
    %404 = arith.mulf %403, %401 : vector<8x32xf32>
    %405 = arith.mulf %394, %373 : vector<8x32xf32>
    %406 = arith.addf %404, %405 : vector<8x32xf32>
    %c3_i32_110 = arith.constant 3 : i32
    %c8_i32_111 = arith.constant 8 : i32
    %407 = arith.muli %c3_i32_110, %c8_i32_111 : i32
    %408 = tpu.assume_multiple %407, 8 : i32
    %409 = arith.index_cast %408 : i32 to index
    %c0_112 = arith.constant 0 : index
    %410 = vector.load %arg9[%409, %c0_112] : memref<64x96xf32, #tpu.memory_space<vmem>>, vector<8x96xf32>
    %cst_113 = arith.constant dense<0.000000e+00> : vector<8x96xf32>
    %411 = tpu.matmul %406, %304, %cst_113 {dimension_numbers = #tpu.dot_dimension_numbers<[1], [0], [0], [1], [0, 0, 1, 1], [], []>} : vector<8x32xf32>, vector<32x96xf32>, vector<8x96xf32> -> vector<8x96xf32>
    %412 = vector.extract_strided_slice %410 {offsets = [0, 0], sizes = [8, 32], strides = [1, 1]} : vector<8x96xf32> to vector<8x32xf32>
    %413 = vector.extract_strided_slice %411 {offsets = [0, 0], sizes = [8, 32], strides = [1, 1]} : vector<8x96xf32> to vector<8x32xf32>
    %414 = arith.addf %412, %413 : vector<8x32xf32>
    %415 = arith.negf %414 : vector<8x32xf32>
    %416 = math.exp %415 : vector<8x32xf32>
    %cst_114 = arith.constant 1.000000e+00 : f32
    %417 = vector.broadcast %cst_114 : f32 to vector<8x32xf32>
    %418 = arith.addf %417, %416 : vector<8x32xf32>
    %419 = arith.divf %417, %418 : vector<8x32xf32>
    %420 = vector.extract_strided_slice %410 {offsets = [0, 32], sizes = [8, 32], strides = [1, 1]} : vector<8x96xf32> to vector<8x32xf32>
    %421 = vector.extract_strided_slice %411 {offsets = [0, 32], sizes = [8, 32], strides = [1, 1]} : vector<8x96xf32> to vector<8x32xf32>
    %422 = arith.addf %420, %421 : vector<8x32xf32>
    %423 = arith.negf %422 : vector<8x32xf32>
    %424 = math.exp %423 : vector<8x32xf32>
    %cst_115 = arith.constant 1.000000e+00 : f32
    %425 = vector.broadcast %cst_115 : f32 to vector<8x32xf32>
    %426 = arith.addf %425, %424 : vector<8x32xf32>
    %427 = arith.divf %425, %426 : vector<8x32xf32>
    %428 = vector.extract_strided_slice %410 {offsets = [0, 64], sizes = [8, 32], strides = [1, 1]} : vector<8x96xf32> to vector<8x32xf32>
    %429 = vector.extract_strided_slice %411 {offsets = [0, 64], sizes = [8, 32], strides = [1, 1]} : vector<8x96xf32> to vector<8x32xf32>
    %430 = vector.broadcast %306 : vector<1x32xf32> to vector<8x32xf32>
    %431 = arith.addf %429, %430 : vector<8x32xf32>
    %432 = arith.mulf %419, %431 : vector<8x32xf32>
    %433 = arith.addf %428, %432 : vector<8x32xf32>
    %434 = math.tanh %433 : vector<8x32xf32>
    %cst_116 = arith.constant 1.000000e+00 : f32
    %435 = vector.broadcast %cst_116 : f32 to vector<8x32xf32>
    %436 = arith.subf %435, %427 : vector<8x32xf32>
    %437 = arith.mulf %436, %434 : vector<8x32xf32>
    %438 = arith.mulf %427, %406 : vector<8x32xf32>
    %439 = arith.addf %437, %438 : vector<8x32xf32>
    %c4_i32_117 = arith.constant 4 : i32
    %c8_i32_118 = arith.constant 8 : i32
    %440 = arith.muli %c4_i32_117, %c8_i32_118 : i32
    %441 = tpu.assume_multiple %440, 8 : i32
    %442 = arith.index_cast %441 : i32 to index
    %c0_119 = arith.constant 0 : index
    %443 = vector.load %arg9[%442, %c0_119] : memref<64x96xf32, #tpu.memory_space<vmem>>, vector<8x96xf32>
    %cst_120 = arith.constant dense<0.000000e+00> : vector<8x96xf32>
    %444 = tpu.matmul %439, %304, %cst_120 {dimension_numbers = #tpu.dot_dimension_numbers<[1], [0], [0], [1], [0, 0, 1, 1], [], []>} : vector<8x32xf32>, vector<32x96xf32>, vector<8x96xf32> -> vector<8x96xf32>
    %445 = vector.extract_strided_slice %443 {offsets = [0, 0], sizes = [8, 32], strides = [1, 1]} : vector<8x96xf32> to vector<8x32xf32>
    %446 = vector.extract_strided_slice %444 {offsets = [0, 0], sizes = [8, 32], strides = [1, 1]} : vector<8x96xf32> to vector<8x32xf32>
    %447 = arith.addf %445, %446 : vector<8x32xf32>
    %448 = arith.negf %447 : vector<8x32xf32>
    %449 = math.exp %448 : vector<8x32xf32>
    %cst_121 = arith.constant 1.000000e+00 : f32
    %450 = vector.broadcast %cst_121 : f32 to vector<8x32xf32>
    %451 = arith.addf %450, %449 : vector<8x32xf32>
    %452 = arith.divf %450, %451 : vector<8x32xf32>
    %453 = vector.extract_strided_slice %443 {offsets = [0, 32], sizes = [8, 32], strides = [1, 1]} : vector<8x96xf32> to vector<8x32xf32>
    %454 = vector.extract_strided_slice %444 {offsets = [0, 32], sizes = [8, 32], strides = [1, 1]} : vector<8x96xf32> to vector<8x32xf32>
    %455 = arith.addf %453, %454 : vector<8x32xf32>
    %456 = arith.negf %455 : vector<8x32xf32>
    %457 = math.exp %456 : vector<8x32xf32>
    %cst_122 = arith.constant 1.000000e+00 : f32
    %458 = vector.broadcast %cst_122 : f32 to vector<8x32xf32>
    %459 = arith.addf %458, %457 : vector<8x32xf32>
    %460 = arith.divf %458, %459 : vector<8x32xf32>
    %461 = vector.extract_strided_slice %443 {offsets = [0, 64], sizes = [8, 32], strides = [1, 1]} : vector<8x96xf32> to vector<8x32xf32>
    %462 = vector.extract_strided_slice %444 {offsets = [0, 64], sizes = [8, 32], strides = [1, 1]} : vector<8x96xf32> to vector<8x32xf32>
    %463 = vector.broadcast %306 : vector<1x32xf32> to vector<8x32xf32>
    %464 = arith.addf %462, %463 : vector<8x32xf32>
    %465 = arith.mulf %452, %464 : vector<8x32xf32>
    %466 = arith.addf %461, %465 : vector<8x32xf32>
    %467 = math.tanh %466 : vector<8x32xf32>
    %cst_123 = arith.constant 1.000000e+00 : f32
    %468 = vector.broadcast %cst_123 : f32 to vector<8x32xf32>
    %469 = arith.subf %468, %460 : vector<8x32xf32>
    %470 = arith.mulf %469, %467 : vector<8x32xf32>
    %471 = arith.mulf %460, %439 : vector<8x32xf32>
    %472 = arith.addf %470, %471 : vector<8x32xf32>
    %c5_i32_124 = arith.constant 5 : i32
    %c8_i32_125 = arith.constant 8 : i32
    %473 = arith.muli %c5_i32_124, %c8_i32_125 : i32
    %474 = tpu.assume_multiple %473, 8 : i32
    %475 = arith.index_cast %474 : i32 to index
    %c0_126 = arith.constant 0 : index
    %476 = vector.load %arg9[%475, %c0_126] : memref<64x96xf32, #tpu.memory_space<vmem>>, vector<8x96xf32>
    %cst_127 = arith.constant dense<0.000000e+00> : vector<8x96xf32>
    %477 = tpu.matmul %472, %304, %cst_127 {dimension_numbers = #tpu.dot_dimension_numbers<[1], [0], [0], [1], [0, 0, 1, 1], [], []>} : vector<8x32xf32>, vector<32x96xf32>, vector<8x96xf32> -> vector<8x96xf32>
    %478 = vector.extract_strided_slice %476 {offsets = [0, 0], sizes = [8, 32], strides = [1, 1]} : vector<8x96xf32> to vector<8x32xf32>
    %479 = vector.extract_strided_slice %477 {offsets = [0, 0], sizes = [8, 32], strides = [1, 1]} : vector<8x96xf32> to vector<8x32xf32>
    %480 = arith.addf %478, %479 : vector<8x32xf32>
    %481 = arith.negf %480 : vector<8x32xf32>
    %482 = math.exp %481 : vector<8x32xf32>
    %cst_128 = arith.constant 1.000000e+00 : f32
    %483 = vector.broadcast %cst_128 : f32 to vector<8x32xf32>
    %484 = arith.addf %483, %482 : vector<8x32xf32>
    %485 = arith.divf %483, %484 : vector<8x32xf32>
    %486 = vector.extract_strided_slice %476 {offsets = [0, 32], sizes = [8, 32], strides = [1, 1]} : vector<8x96xf32> to vector<8x32xf32>
    %487 = vector.extract_strided_slice %477 {offsets = [0, 32], sizes = [8, 32], strides = [1, 1]} : vector<8x96xf32> to vector<8x32xf32>
    %488 = arith.addf %486, %487 : vector<8x32xf32>
    %489 = arith.negf %488 : vector<8x32xf32>
    %490 = math.exp %489 : vector<8x32xf32>
    %cst_129 = arith.constant 1.000000e+00 : f32
    %491 = vector.broadcast %cst_129 : f32 to vector<8x32xf32>
    %492 = arith.addf %491, %490 : vector<8x32xf32>
    %493 = arith.divf %491, %492 : vector<8x32xf32>
    %494 = vector.extract_strided_slice %476 {offsets = [0, 64], sizes = [8, 32], strides = [1, 1]} : vector<8x96xf32> to vector<8x32xf32>
    %495 = vector.extract_strided_slice %477 {offsets = [0, 64], sizes = [8, 32], strides = [1, 1]} : vector<8x96xf32> to vector<8x32xf32>
    %496 = vector.broadcast %306 : vector<1x32xf32> to vector<8x32xf32>
    %497 = arith.addf %495, %496 : vector<8x32xf32>
    %498 = arith.mulf %485, %497 : vector<8x32xf32>
    %499 = arith.addf %494, %498 : vector<8x32xf32>
    %500 = math.tanh %499 : vector<8x32xf32>
    %cst_130 = arith.constant 1.000000e+00 : f32
    %501 = vector.broadcast %cst_130 : f32 to vector<8x32xf32>
    %502 = arith.subf %501, %493 : vector<8x32xf32>
    %503 = arith.mulf %502, %500 : vector<8x32xf32>
    %504 = arith.mulf %493, %472 : vector<8x32xf32>
    %505 = arith.addf %503, %504 : vector<8x32xf32>
    %c6_i32_131 = arith.constant 6 : i32
    %c8_i32_132 = arith.constant 8 : i32
    %506 = arith.muli %c6_i32_131, %c8_i32_132 : i32
    %507 = tpu.assume_multiple %506, 8 : i32
    %508 = arith.index_cast %507 : i32 to index
    %c0_133 = arith.constant 0 : index
    %509 = vector.load %arg9[%508, %c0_133] : memref<64x96xf32, #tpu.memory_space<vmem>>, vector<8x96xf32>
    %cst_134 = arith.constant dense<0.000000e+00> : vector<8x96xf32>
    %510 = tpu.matmul %505, %304, %cst_134 {dimension_numbers = #tpu.dot_dimension_numbers<[1], [0], [0], [1], [0, 0, 1, 1], [], []>} : vector<8x32xf32>, vector<32x96xf32>, vector<8x96xf32> -> vector<8x96xf32>
    %511 = vector.extract_strided_slice %509 {offsets = [0, 0], sizes = [8, 32], strides = [1, 1]} : vector<8x96xf32> to vector<8x32xf32>
    %512 = vector.extract_strided_slice %510 {offsets = [0, 0], sizes = [8, 32], strides = [1, 1]} : vector<8x96xf32> to vector<8x32xf32>
    %513 = arith.addf %511, %512 : vector<8x32xf32>
    %514 = arith.negf %513 : vector<8x32xf32>
    %515 = math.exp %514 : vector<8x32xf32>
    %cst_135 = arith.constant 1.000000e+00 : f32
    %516 = vector.broadcast %cst_135 : f32 to vector<8x32xf32>
    %517 = arith.addf %516, %515 : vector<8x32xf32>
    %518 = arith.divf %516, %517 : vector<8x32xf32>
    %519 = vector.extract_strided_slice %509 {offsets = [0, 32], sizes = [8, 32], strides = [1, 1]} : vector<8x96xf32> to vector<8x32xf32>
    %520 = vector.extract_strided_slice %510 {offsets = [0, 32], sizes = [8, 32], strides = [1, 1]} : vector<8x96xf32> to vector<8x32xf32>
    %521 = arith.addf %519, %520 : vector<8x32xf32>
    %522 = arith.negf %521 : vector<8x32xf32>
    %523 = math.exp %522 : vector<8x32xf32>
    %cst_136 = arith.constant 1.000000e+00 : f32
    %524 = vector.broadcast %cst_136 : f32 to vector<8x32xf32>
    %525 = arith.addf %524, %523 : vector<8x32xf32>
    %526 = arith.divf %524, %525 : vector<8x32xf32>
    %527 = vector.extract_strided_slice %509 {offsets = [0, 64], sizes = [8, 32], strides = [1, 1]} : vector<8x96xf32> to vector<8x32xf32>
    %528 = vector.extract_strided_slice %510 {offsets = [0, 64], sizes = [8, 32], strides = [1, 1]} : vector<8x96xf32> to vector<8x32xf32>
    %529 = vector.broadcast %306 : vector<1x32xf32> to vector<8x32xf32>
    %530 = arith.addf %528, %529 : vector<8x32xf32>
    %531 = arith.mulf %518, %530 : vector<8x32xf32>
    %532 = arith.addf %527, %531 : vector<8x32xf32>
    %533 = math.tanh %532 : vector<8x32xf32>
    %cst_137 = arith.constant 1.000000e+00 : f32
    %534 = vector.broadcast %cst_137 : f32 to vector<8x32xf32>
    %535 = arith.subf %534, %526 : vector<8x32xf32>
    %536 = arith.mulf %535, %533 : vector<8x32xf32>
    %537 = arith.mulf %526, %505 : vector<8x32xf32>
    %538 = arith.addf %536, %537 : vector<8x32xf32>
    %c7_i32_138 = arith.constant 7 : i32
    %c8_i32_139 = arith.constant 8 : i32
    %539 = arith.muli %c7_i32_138, %c8_i32_139 : i32
    %540 = tpu.assume_multiple %539, 8 : i32
    %541 = arith.index_cast %540 : i32 to index
    %c0_140 = arith.constant 0 : index
    %542 = vector.load %arg9[%541, %c0_140] : memref<64x96xf32, #tpu.memory_space<vmem>>, vector<8x96xf32>
    %cst_141 = arith.constant dense<0.000000e+00> : vector<8x96xf32>
    %543 = tpu.matmul %538, %304, %cst_141 {dimension_numbers = #tpu.dot_dimension_numbers<[1], [0], [0], [1], [0, 0, 1, 1], [], []>} : vector<8x32xf32>, vector<32x96xf32>, vector<8x96xf32> -> vector<8x96xf32>
    %544 = vector.extract_strided_slice %542 {offsets = [0, 0], sizes = [8, 32], strides = [1, 1]} : vector<8x96xf32> to vector<8x32xf32>
    %545 = vector.extract_strided_slice %543 {offsets = [0, 0], sizes = [8, 32], strides = [1, 1]} : vector<8x96xf32> to vector<8x32xf32>
    %546 = arith.addf %544, %545 : vector<8x32xf32>
    %547 = arith.negf %546 : vector<8x32xf32>
    %548 = math.exp %547 : vector<8x32xf32>
    %cst_142 = arith.constant 1.000000e+00 : f32
    %549 = vector.broadcast %cst_142 : f32 to vector<8x32xf32>
    %550 = arith.addf %549, %548 : vector<8x32xf32>
    %551 = arith.divf %549, %550 : vector<8x32xf32>
    %552 = vector.extract_strided_slice %542 {offsets = [0, 32], sizes = [8, 32], strides = [1, 1]} : vector<8x96xf32> to vector<8x32xf32>
    %553 = vector.extract_strided_slice %543 {offsets = [0, 32], sizes = [8, 32], strides = [1, 1]} : vector<8x96xf32> to vector<8x32xf32>
    %554 = arith.addf %552, %553 : vector<8x32xf32>
    %555 = arith.negf %554 : vector<8x32xf32>
    %556 = math.exp %555 : vector<8x32xf32>
    %cst_143 = arith.constant 1.000000e+00 : f32
    %557 = vector.broadcast %cst_143 : f32 to vector<8x32xf32>
    %558 = arith.addf %557, %556 : vector<8x32xf32>
    %559 = arith.divf %557, %558 : vector<8x32xf32>
    %560 = vector.extract_strided_slice %542 {offsets = [0, 64], sizes = [8, 32], strides = [1, 1]} : vector<8x96xf32> to vector<8x32xf32>
    %561 = vector.extract_strided_slice %543 {offsets = [0, 64], sizes = [8, 32], strides = [1, 1]} : vector<8x96xf32> to vector<8x32xf32>
    %562 = vector.broadcast %306 : vector<1x32xf32> to vector<8x32xf32>
    %563 = arith.addf %561, %562 : vector<8x32xf32>
    %564 = arith.mulf %551, %563 : vector<8x32xf32>
    %565 = arith.addf %560, %564 : vector<8x32xf32>
    %566 = math.tanh %565 : vector<8x32xf32>
    %cst_144 = arith.constant 1.000000e+00 : f32
    %567 = vector.broadcast %cst_144 : f32 to vector<8x32xf32>
    %568 = arith.subf %567, %559 : vector<8x32xf32>
    %569 = arith.mulf %568, %566 : vector<8x32xf32>
    %570 = arith.mulf %559, %538 : vector<8x32xf32>
    %571 = arith.addf %569, %570 : vector<8x32xf32>
    %c8_i32_145 = arith.constant 8 : i32
    %c0_146 = arith.constant 0 : index
    %c0_147 = arith.constant 0 : index
    %572 = vector.load %arg5[%c0_146, %c0_147] : memref<32x2xf32, #tpu.memory_space<vmem>>, vector<32x2xf32>
    %cst_148 = arith.constant dense<0.000000e+00> : vector<8x2xf32>
    %573 = tpu.matmul %571, %572, %cst_148 {dimension_numbers = #tpu.dot_dimension_numbers<[1], [0], [0], [1], [0, 0, 1, 1], [], []>} : vector<8x32xf32>, vector<32x2xf32>, vector<8x2xf32> -> vector<8x2xf32>
    %c0_149 = arith.constant 0 : index
    %c0_150 = arith.constant 0 : index
    %574 = vector.load %arg6[%c0_149, %c0_150] : memref<1x2xf32, #tpu.memory_space<vmem>>, vector<1x2xf32>
    %575 = vector.broadcast %574 : vector<1x2xf32> to vector<8x2xf32>
    %576 = arith.addf %573, %575 : vector<8x2xf32>
    %c0_151 = arith.constant 0 : index
    %c0_152 = arith.constant 0 : index
    %577 = vector.load %arg7[%c0_151, %c0_152] : memref<8x2xf32, #tpu.memory_space<vmem>>, vector<8x2xf32>
    tpu.vector_store %arg7[%c0_151, %c0_152], %576 {strides = array<i32>} : memref<8x2xf32, #tpu.memory_space<vmem>>, vector<8x2xf32>,
    return
  }
}

</mosaic_0001>

<bundles_post_ra>
// kernel: gru_classifier_forward.1
= control target key start
LH: loop header
LB: loop body
LE: loop exit
PB: predicated region body
PF: predicated region fallthrough
CT: control target
= control target key end

     0   :  { %v2753_v0 = vmov 0.0|0.0   ;;  %vm2754_vm0 = vmmov 0   ;;  %v2755_v4 = vmov 0.0   ;;  %vm45_vm1 = vcmask 261120   ;;  %s2756_s21 = smov 64   ;;  %s2757_s26 = smov 96   ;;  %s3179_s1 = inlined_call_operand.vmem [shape: f32[2,32,96], index: 1, kind: input, shape index: {}]   ;;  %s3180_s2 = inlined_call_operand.vmem [shape: f32[2,32,96], index: 2, kind: input, shape index: {}]   ;;  %s3181_s0 = inlined_call_operand.vmem [shape: f32[64,32], index: 0, kind: input, shape index: {}]   ;;  %s3182_s4 = inlined_call_operand.vmem [shape: f32[2,1,32], index: 4, kind: input, shape index: {}]   ;;  %s3183_s3 = inlined_call_operand.vmem [shape: f32[2,1,96], index: 3, kind: input, shape index: {}]   ;;  %s3184_s5 = inlined_call_operand.vmem [shape: f32[32,2], index: 5, kind: input, shape index: {}]   ;;  %s3185_s6 = inlined_call_operand.vmem [shape: f32[1,2], index: 6, kind: input, shape index: {}]   ;;  %s3186_s7 = inlined_call_operand.vmem [shape: f32[8,2], index: 7, kind: output, shape index: {}]  }
   0x1   :  { %2542 = vmatprep.subr.bf16.mxu1 %v2753_v0  ;;  %v34_v1 = vld [vmem:[%s3179_s1] sm:$0xff]  ;;  %v35_v2 = vld [vmem:[%s3179_s1 + $0x8] sm:$0xff]  ;;  %2335 = vmatprep.mubr.msk.f32.mxu1 %vm2754_vm0, %v2755_v4  ;;  %v36_v7 = vld [vmem:[%s3179_s1 + $0x10] sm:$0xff]  ;;  %vm175_vm2 = vcmask 785408   ;;  %vm2130_vm3 = vcmask 15360  }
   0x2   :  { %v184_v3 = vld [vmem:[%s3180_s2] sm:$0xff]  ;;  %v2534_v5 = vpack.c.bf16 %v35_v2, %v34_v1  ;;  %v185_v6 = vld [vmem:[%s3180_s2 + $0x8] sm:$0xff]  ;;  %v37_v8 = vld [vmem:[%s3179_s1 + $0x18] sm:$0xff] }
   0x3   :  { %v2819_v9 = vpack.c.bf16 %v185_v6, %v184_v3  ;;  %v2538_v10 = vpack.c.bf16 %v37_v8, %v36_v7  ;;  %v186_v11 = vld [vmem:[%s3180_s2 + $0x10] sm:$0xff]  ;;  %v187_v12 = vld [vmem:[%s3180_s2 + $0x18] sm:$0xff]  ;;  %v26_v13 = vld [vmem:[%s3181_s0] sm:$0xff] }
   0x4   :  { %2535 = vmatprep.subr.bf16.mxu0 %v2534_v5  ;;  %2315 = vmatprep.mubr.msk.f32.mxu0 %vm45_vm1, %v26_v13  ;;  %v2146_v14 = vld [vmem:[%s3182_s4] ss:$0 sm:$0xff]  ;;  %v2835_v15 = vpack.c.bf16 %v187_v12, %v186_v11  ;;  %v27_v16 = vld [vmem:[%s3181_s0 + $0x8] sm:$0xff]  ;;  %v28_v56 = vld [vmem:[%s3181_s0 + $0x10] sm:$0xff] }
   0x5   :  { %2544 = vmatpush3.bf16.msra.mxu1 %v2819_v9  ;;  %2537 = vmatpush3.bf16.msra.mxu0 %v2534_v5  ;;  %v2862_v18 = vld [vmem:[%s3183_s3] ss:$0 sm:$0xff]  ;;  %v29_v57 = vld [vmem:[%s3181_s0 + $0x18] sm:$0xff]  ;;  %v31_v59 = vld [vmem:[%s3181_s0 + $0x28] sm:$0xff] }
   0x6   :  { %2545 = vmatprep.subr.bf16.mxu1 %v2753_v0  ;;  %2539 = vmatprep.subr.bf16.mxu0 %v2538_v10  ;;  %v30_v58 = vld [vmem:[%s3181_s0 + $0x20] sm:$0xff]  ;;  %v32_v60 = vld [vmem:[%s3181_s0 + $0x30] sm:$0xff]  ;;  %v33_v61 = vld [vmem:[%s3181_s0 + $0x38] sm:$0xff] }
   0x7   :  { %275 = vrot.lane.b32.xlu0 %v2146_v14, %s2756_s21 }
   0x9   :  { %2547 = vmatpush3.bf16.msra.mxu1 %v2835_v15  ;;  %2541 = vmatpush3.bf16.msra.mxu0 %v2538_v10 }
   0xa   :  { %2548 = vmatprep.subr.bf16.mxu1 %v2753_v0  ;;  %2554 = vmatprep.subr.bf16.mxu0 %v2753_v0 }
   0xc   :  { %2336 = vmatmul.mubr.f32.vlgmr.msra.gmra.mrb[0].mxu1 %v2755_v4  ;;  %2316 = vmatmul.mubr.msk.f32.vlgmr.msra.gmra.mrb[0].mxu0 %vm45_vm1, %v27_v16 }
   0xd   :  { %2550 = vmatpush3.bf16.msra.mxu1 %v2819_v9  ;;  %2346 = vmatprep.mubr.msk.f32.mxu1 %vm2754_vm0, %v2755_v4 }
   0xe   :  { %2551 = vmatprep.subr.bf16.mxu1 %v2753_v0  ;;  %2556 = vmatpush3.bf16.msra.mxu0 %v2819_v9 }
   0xf   :  { %2557 = vmatprep.subr.bf16.mxu0 %v2753_v0  ;;  %2318 = vmatprep.mubr.msk.f32.mxu0 %vm45_vm1, %v28_v56 }
  0x10   :  { %2319 = vmatmul.mubr.msk.f32.gmra.mrb[2].mxu0 %vm45_vm1, %v29_v57 }
  0x11   :  { %2553 = vmatpush3.bf16.msra.mxu1 %v2835_v15  ;;  %2321 = vmatprep.mubr.msk.f32.mxu0 %vm45_vm1, %v30_v58 }
  0x12   :  { %2559 = vmatpush3.bf16.msra.mxu0 %v2835_v15  ;;  %2560 = vmatprep.subr.bf16.mxu1 %v2753_v0 }
  0x13   :  { %2566 = vmatprep.subr.bf16.mxu0 %v2753_v0 }
  0x14   :  { %2322 = vmatmul.mubr.msk.f32.gmra.mrb[4].mxu0 %vm45_vm1, %v31_v59 }
  0x15   :  { %2324 = vmatprep.mubr.msk.f32.mxu0 %vm45_vm1, %v32_v60 }
  0x18   :  { %2325 = vmatmul.mubr.msk.f32.gmra.mrb[6].mxu0 %vm45_vm1, %v33_v61 }
  0x19   :  { %2357 = vmatprep.mubr.msk.f32.mxu0 %vm2754_vm0, %v2755_v4 }
  0x79   :  { %v2857_v17 = vpop.permute.xlu0 %275 }
  0xdf   :  { %v259_v19 = vpop.f32.mrb[0].mxu1  ;;  %v2317_v20 = vpop.f32.mrb[0].mxu0 }
  0xe0   :  { %v278_v21 = vadd.f32 %v2857_v17, %v259_v19  ;;  %v142_v22 = vadd.f32 %v2317_v20, %v2862_v18  ;;  %v2337_v23 = vpop.f32.mrb[1].mxu1  ;;  %v136_v24 = vpop.f32.mrb[1].mxu0 }
  0xe1   :  { %v137_v25 = vadd.f32 %v2862_v18, %v136_v24 }
  0xe2   :  { %177 = vst.msk [vmem:[#allocation3 + $0x8] sm:$0xff] %vm175_vm2, %v142_v22  ;;  %280 = vrot.lane.b32.xlu0 %v278_v21, %s2756_s21 }
  0xe3   :  { %176 = vst.msk [vmem:[#allocation3] sm:$0xff] %vm175_vm2, %v137_v25  ;;  %v2320_v6 = vpop.f32.mrb[2].mxu0 }
  0xe4   :  { %v152_v7 = vadd.f32 %v2320_v6, %v2862_v18  ;;  %v146_v8 = vpop.f32.mrb[3].mxu0 }
  0xe5   :  { %v147_v10 = vadd.f32 %v2862_v18, %v146_v8 }
  0xe6   :  { %179 = vst.msk [vmem:[#allocation3 + $0x18] sm:$0xff] %vm175_vm2, %v152_v7 }
  0xe7   :  { %178 = vst.msk [vmem:[#allocation3 + $0x10] sm:$0xff] %vm175_vm2, %v147_v10  ;;  %v2323_v11 = vpop.f32.mrb[4].mxu0 }
  0xe8   :  { %v162_v12 = vadd.f32 %v2323_v11, %v2862_v18  ;;  %v156_v13 = vpop.f32.mrb[5].mxu0 }
  0xe9   :  { %v304_v46 = vld [vmem:[#allocation3 + $0x8] sm:$0xff]  ;;  %v157_v14 = vadd.f32 %v2862_v18, %v156_v13 }
  0xea   :  { %v189_v26 = vld [vmem:[#allocation3] sm:$0xff]  ;;  %181 = vst.msk [vmem:[#allocation3 + $0x28] sm:$0xff] %vm175_vm2, %v162_v12 }
  0xeb   :  { %v263_v27 = vadd.f32 %v259_v19, %v189_v26  ;;  %180 = vst.msk [vmem:[#allocation3 + $0x20] sm:$0xff] %vm175_vm2, %v157_v14  ;;  %v2326_v16 = vpop.f32.mrb[6].mxu0 }
  0xec   :  { %v172_v19 = vadd.f32 %v2326_v16, %v2862_v18  ;;  %v166_v20 = vpop.f32.mrb[7].mxu0 }
  0xed   :  { %v2145_v28 = vmul.f32 -1.442695, %v263_v27  ;;  %v167_v21 = vadd.f32 %v2862_v18, %v166_v20 }
  0xee   :  { %183 = vst.msk [vmem:[#allocation3 + $0x38] sm:$0xff] %vm175_vm2, %v172_v19  ;;  %v411_v25 = vld [vmem:[#allocation3 + $0x10] sm:$0xff] }
  0xef   :  { %2657 = vpow2.f32 %v2145_v28  ;;  %182 = vst.msk [vmem:[#allocation3 + $0x30] sm:$0xff] %vm175_vm2, %v167_v21 }
  0xf9   :  { %v2658_v29 = vpop.eup %2657 }
  0xfa   :  { %v267_v30 = vadd.f32 1.0, %v2658_v29 }
  0xfc   :  { %2659 = vrcp.f32 %v267_v30 }
 0x106   :  { %v2660_v31 = vpop.eup %2659 }
 0x107   :  { %v290_v37 = vsub.f32 1.0, %v2660_v31  ;;  %v296_v39 = vmul.f32 0.0, %v2660_v31 }
 0x154   :  { %v281_v32 = vpop.permute.xlu0 %280 }
 0x155   :  { %v283_v33 = vmul.f32 %v2660_v31, %v281_v32 }
 0x157   :  { %285 = vrot.lane.b32.xlu1 %v283_v33, %s2756_s21 }
 0x1c9   :  { %v286_v34 = vpop.permute.xlu1 %285 }
 0x1ca   :  { %v288_v35 = vadd.f32 %v286_v34, %v189_v26 }
 0x1cc   :  { %2661 = vtanh.f32 %v288_v35 }
 0x1d6   :  { %v2662_v36 = vpop.eup %2661 }
 0x1d7   :  { %292 = vrot.lane.b32.xlu1 %v2662_v36, %s2757_s26 }
 0x249   :  { %v293_v38 = vpop.permute.xlu1 %292 }
 0x24a   :  { %v295_v40 = vmul.f32 %v293_v38, %v290_v37 }
 0x24c   :  { %v297_v41 = vadd.f32 %v296_v39, %v295_v40 }
 0x24e   :  { %299 = vrot.lane.b32.xlu0 %v297_v41, %s2757_s26 }
 0x2c0   :  { %v300_v42 = vpop.permute.xlu0 %299 }
 0x2c1   :  { %302 = vst.msk [vmem:[#allocation2] sm:$0xff] %vm45_vm1, %v300_v42  ;;  %2347 = vmatmul.mubr.msk.f32.vlgmr.msra.gmra.mrb[2].mxu1 %vm45_vm1, %v300_v42 }
 0x2c2   :  { %2562 = vmatpush3.bf16.msra.mxu1 %v2819_v9  ;;  %2368 = vmatprep.mubr.msk.f32.mxu1 %vm2754_vm0, %v2755_v4 }
 0x2c3   :  { %2563 = vmatprep.subr.bf16.mxu1 %v2753_v0 }
 0x2c6   :  { %2565 = vmatpush3.bf16.msra.mxu1 %v2835_v15 }
 0x2c7   :  { %2572 = vmatprep.subr.bf16.mxu1 %v2753_v0 }
 0x394   :  { %v373_v43 = vpop.f32.mrb[2].mxu1 }
 0x395   :  { %v384_v44 = vadd.f32 %v373_v43, %v2857_v17  ;;  %v2348_v45 = vpop.f32.mrb[3].mxu1  ;;  %v377_v47 = vadd.f32 %v373_v43, %v304_v46 }
 0x396   :  { %v518_v45 = vld [vmem:[#allocation3 + $0x18] sm:$0xff] }
 0x397   :  { %386 = vrot.lane.b32.xlu1 %v384_v44, %s2756_s21  ;;  %v2148_v48 = vmul.f32 -1.442695, %v377_v47 }
 0x399   :  { %2663 = vpow2.f32 %v2148_v48 }
 0x3a3   :  { %v2664_v49 = vpop.eup %2663 }
 0x3a4   :  { %v381_v50 = vadd.f32 1.0, %v2664_v49 }
 0x3a6   :  { %2665 = vrcp.f32 %v381_v50 }
 0x3b0   :  { %v2666_v51 = vpop.eup %2665 }
 0x3b1   :  { %v396_v63 = vsub.f32 1.0, %v2666_v51  ;;  %v402_v2 = vmul.f32 %v2666_v51, %v297_v41 }
 0x409   :  { %v387_v52 = vpop.permute.xlu1 %386 }
 0x40a   :  { %v389_v53 = vmul.f32 %v2666_v51, %v387_v52 }
 0x40c   :  { %391 = vrot.lane.b32.xlu0 %v389_v53, %s2756_s21 }
 0x47e   :  { %v392_v54 = vpop.permute.xlu0 %391 }
 0x47f   :  { %v394_v55 = vadd.f32 %v392_v54, %v304_v46 }
 0x481   :  { %2667 = vtanh.f32 %v394_v55 }
 0x48b   :  { %v2668_v62 = vpop.eup %2667 }
 0x48c   :  { %398 = vrot.lane.b32.xlu1 %v2668_v62, %s2757_s26 }
 0x4fe   :  { %v399_v1 = vpop.permute.xlu1 %398 }
 0x4ff   :  { %v401_v3 = vmul.f32 %v399_v1, %v396_v63 }
 0x501   :  { %v403_v5 = vadd.f32 %v402_v2, %v401_v3  ;;  %v625_v2 = vld [vmem:[#allocation3 + $0x20] sm:$0xff] }
 0x503   :  { %405 = vrot.lane.b32.xlu0 %v403_v5, %s2757_s26 }
 0x575   :  { %v406_v22 = vpop.permute.xlu0 %405 }
 0x576   :  { %409 = vst.msk [vmem:[#allocation2 + $0x8] sm:$0xff] %vm45_vm1, %v406_v22  ;;  %2358 = vmatmul.mubr.msk.f32.vlgmr.msra.gmra.mrb[8].mxu0 %vm45_vm1, %v406_v22 }
 0x577   :  { %2568 = vmatpush3.bf16.msra.mxu0 %v2819_v9  ;;  %2379 = vmatprep.mubr.msk.f32.mxu0 %vm2754_vm0, %v2755_v4 }
 0x578   :  { %2569 = vmatprep.subr.bf16.mxu0 %v2753_v0 }
 0x57b   :  { %2571 = vmatpush3.bf16.msra.mxu0 %v2835_v15 }
 0x57c   :  { %2578 = vmatprep.subr.bf16.mxu0 %v2753_v0 }
 0x649   :  { %v480_v18 = vpop.f32.mrb[8].mxu0 }
 0x64a   :  { %v491_v23 = vadd.f32 %v480_v18, %v2857_v17  ;;  %v2359_v24 = vpop.f32.mrb[9].mxu0  ;;  %v484_v26 = vadd.f32 %v480_v18, %v411_v25 }
 0x64c   :  { %493 = vrot.lane.b32.xlu1 %v491_v23, %s2756_s21  ;;  %v2150_v27 = vmul.f32 -1.442695, %v484_v26  ;;  %v732_v26 = vld [vmem:[#allocation3 + $0x28] sm:$0xff] }
 0x64e   :  { %2669 = vpow2.f32 %v2150_v27 }
 0x658   :  { %v2670_v28 = vpop.eup %2669 }
 0x659   :  { %v488_v29 = vadd.f32 1.0, %v2670_v28 }
 0x65b   :  { %2671 = vrcp.f32 %v488_v29 }
 0x665   :  { %v2672_v30 = vpop.eup %2671 }
 0x666   :  { %v503_v36 = vsub.f32 1.0, %v2672_v30  ;;  %v509_v38 = vmul.f32 %v2672_v30, %v403_v5 }
 0x6be   :  { %v494_v31 = vpop.permute.xlu1 %493 }
 0x6bf   :  { %v496_v32 = vmul.f32 %v2672_v30, %v494_v31 }
 0x6c1   :  { %498 = vrot.lane.b32.xlu0 %v496_v32, %s2756_s21 }
 0x733   :  { %v499_v33 = vpop.permute.xlu0 %498 }
 0x734   :  { %v501_v34 = vadd.f32 %v499_v33, %v411_v25 }
 0x736   :  { %2673 = vtanh.f32 %v501_v34  ;;  %v2161_v34 = vld [vmem:[%s3179_s1 + $0x20] sm:$0xff] }
 0x740   :  { %v2674_v35 = vpop.eup %2673 }
 0x741   :  { %505 = vrot.lane.b32.xlu1 %v2674_v35, %s2757_s26  ;;  %v2162_v35 = vld [vmem:[%s3179_s1 + $0x28] sm:$0xff] }
 0x7b3   :  { %v506_v37 = vpop.permute.xlu1 %505 }
 0x7b4   :  { %v508_v39 = vmul.f32 %v506_v37, %v503_v36  ;;  %v2590_v36 = vpack.c.bf16 %v2162_v35, %v2161_v34 }
 0x7b6   :  { %v510_v40 = vadd.f32 %v509_v38, %v508_v39 }
 0x7b8   :  { %512 = vrot.lane.b32.xlu0 %v510_v40, %s2757_s26 }
 0x82a   :  { %v513_v41 = vpop.permute.xlu0 %512 }
 0x82b   :  { %516 = vst.msk [vmem:[#allocation2 + $0x10] sm:$0xff] %vm45_vm1, %v513_v41  ;;  %2369 = vmatmul.mubr.msk.f32.vlgmr.msra.gmra.mrb[4].mxu1 %vm45_vm1, %v513_v41 }
 0x82c   :  { %2574 = vmatpush3.bf16.msra.mxu1 %v2819_v9  ;;  %2390 = vmatprep.mubr.msk.f32.mxu1 %vm2754_vm0, %v2755_v4 }
 0x82d   :  { %2575 = vmatprep.subr.bf16.mxu1 %v2753_v0 }
 0x830   :  { %2577 = vmatpush3.bf16.msra.mxu1 %v2835_v15 }
 0x831   :  { %2584 = vmatprep.subr.bf16.mxu1 %v2753_v0 }
 0x8fe   :  { %v587_v42 = vpop.f32.mrb[4].mxu1 }
 0x8ff   :  { %v598_v43 = vadd.f32 %v587_v42, %v2857_v17  ;;  %v2370_v44 = vpop.f32.mrb[5].mxu1  ;;  %v591_v46 = vadd.f32 %v587_v42, %v518_v45 }
 0x900   :  { %v2164_v44 = vld [vmem:[%s3179_s1 + $0x38] sm:$0xff] }
 0x901   :  { %600 = vrot.lane.b32.xlu1 %v598_v43, %s2756_s21  ;;  %v2152_v47 = vmul.f32 -1.442695, %v591_v46  ;;  %v2163_v43 = vld [vmem:[%s3179_s1 + $0x30] sm:$0xff] }
 0x903   :  { %2675 = vpow2.f32 %v2152_v47  ;;  %v1052_v47 = vld [vmem:[#allocation2] sm:$0xff] }
 0x90d   :  { %v2676_v48 = vpop.eup %2675 }
 0x90e   :  { %v595_v49 = vadd.f32 1.0, %v2676_v48  ;;  %v1053_v48 = vld [vmem:[#allocation2 + $0x8] sm:$0xff] }
 0x910   :  { %2677 = vrcp.f32 %v595_v49  ;;  %v1054_v49 = vld [vmem:[#allocation2 + $0x10] sm:$0xff] }
 0x91a   :  { %v2678_v50 = vpop.eup %2677 }
 0x91b   :  { %v610_v56 = vsub.f32 1.0, %v2678_v50  ;;  %v616_v58 = vmul.f32 %v2678_v50, %v510_v40 }
 0x973   :  { %v601_v51 = vpop.permute.xlu1 %600 }
 0x974   :  { %v603_v52 = vmul.f32 %v2678_v50, %v601_v51 }
 0x976   :  { %605 = vrot.lane.b32.xlu0 %v603_v52, %s2756_s21 }
 0x9e8   :  { %v606_v53 = vpop.permute.xlu0 %605 }
 0x9e9   :  { %v608_v54 = vadd.f32 %v606_v53, %v518_v45  ;;  %v2594_v45 = vpack.c.bf16 %v2164_v44, %v2163_v43 }
 0x9eb   :  { %2679 = vtanh.f32 %v608_v54 }
 0x9f5   :  { %v2680_v55 = vpop.eup %2679 }
 0x9f6   :  { %612 = vrot.lane.b32.xlu1 %v2680_v55, %s2757_s26 }
 0xa68   :  { %v613_v57 = vpop.permute.xlu1 %612 }
 0xa69   :  { %v615_v59 = vmul.f32 %v613_v57, %v610_v56  ;;  %v3004_v56 = vld [vmem:[%s3183_s3 + $0x1] ss:$0 sm:$0xff] }
 0xa6b   :  { %v617_v60 = vadd.f32 %v616_v58, %v615_v59 }
 0xa6d   :  { %619 = vrot.lane.b32.xlu0 %v617_v60, %s2757_s26 }
 0xadf   :  { %v620_v61 = vpop.permute.xlu0 %619 }
 0xae0   :  { %623 = vst.msk [vmem:[#allocation2 + $0x18] sm:$0xff] %vm45_vm1, %v620_v61  ;;  %2380 = vmatmul.mubr.msk.f32.vlgmr.msra.gmra.mrb[10].mxu0 %vm45_vm1, %v620_v61 }
 0xae1   :  { %2580 = vmatpush3.bf16.msra.mxu0 %v2819_v9  ;;  %2401 = vmatprep.mubr.msk.f32.mxu0 %vm2754_vm0, %v2755_v4 }
 0xae2   :  { %2581 = vmatprep.subr.bf16.mxu0 %v2753_v0 }
 0xae5   :  { %2583 = vmatpush3.bf16.msra.mxu0 %v2835_v15 }
 0xae6   :  { %2591 = vmatprep.subr.bf16.mxu0 %v2590_v36 }
 0xae7   :  { %v1055_v50 = vld [vmem:[#allocation2 + $0x18] sm:$0xff] }
 0xbb3   :  { %v694_v62 = vpop.f32.mrb[10].mxu0 }
 0xbb4   :  { %v705_v63 = vadd.f32 %v694_v62, %v2857_v17  ;;  %v2381_v1 = vpop.f32.mrb[11].mxu0  ;;  %v698_v3 = vadd.f32 %v694_v62, %v625_v2 }
 0xbb6   :  { %707 = vrot.lane.b32.xlu1 %v705_v63, %s2756_s21  ;;  %v2154_v5 = vmul.f32 -1.442695, %v698_v3 }
 0xbb8   :  { %2681 = vpow2.f32 %v2154_v5 }
 0xbc2   :  { %v2682_v6 = vpop.eup %2681 }
 0xbc3   :  { %v702_v7 = vadd.f32 1.0, %v2682_v6 }
 0xbc5   :  { %2683 = vrcp.f32 %v702_v7  ;;  %v839_v7 = vld [vmem:[#allocation3 + $0x30] sm:$0xff] }
 0xbcf   :  { %v2684_v8 = vpop.eup %2683 }
 0xbd0   :  { %v717_v16 = vsub.f32 1.0, %v2684_v8  ;;  %v723_v20 = vmul.f32 %v2684_v8, %v617_v60 }
 0xc28   :  { %v708_v10 = vpop.permute.xlu1 %707 }
 0xc29   :  { %v710_v11 = vmul.f32 %v2684_v8, %v708_v10 }
 0xc2b   :  { %712 = vrot.lane.b32.xlu0 %v710_v11, %s2756_s21 }
 0xc9d   :  { %v713_v12 = vpop.permute.xlu0 %712 }
 0xc9e   :  { %v715_v13 = vadd.f32 %v713_v12, %v625_v2 }
 0xca0   :  { %2685 = vtanh.f32 %v715_v13 }
 0xcaa   :  { %v2686_v14 = vpop.eup %2685 }
 0xcab   :  { %719 = vrot.lane.b32.xlu1 %v2686_v14, %s2757_s26 }
 0xd1d   :  { %v720_v19 = vpop.permute.xlu1 %719 }
 0xd1e   :  { %v722_v21 = vmul.f32 %v720_v19, %v717_v16 }
 0xd20   :  { %v724_v22 = vadd.f32 %v723_v20, %v722_v21 }
 0xd22   :  { %726 = vrot.lane.b32.xlu0 %v724_v22, %s2757_s26 }
 0xd94   :  { %v727_v18 = vpop.permute.xlu0 %726 }
 0xd95   :  { %730 = vst.msk [vmem:[#allocation2 + $0x20] sm:$0xff] %vm45_vm1, %v727_v18  ;;  %2391 = vmatmul.mubr.msk.f32.vlgmr.msra.gmra.mrb[6].mxu1 %vm45_vm1, %v727_v18  ;;  %v2176_v18 = vld [vmem:[%s3180_s2 + $0x28] sm:$0xff] }
 0xd96   :  { %2586 = vmatpush3.bf16.msra.mxu1 %v2819_v9  ;;  %2412 = vmatprep.mubr.msk.f32.mxu1 %vm2754_vm0, %v2755_v4 }
 0xd97   :  { %2587 = vmatprep.subr.bf16.mxu1 %v2753_v0 }
 0xd9a   :  { %2589 = vmatpush3.bf16.msra.mxu1 %v2835_v15 }
 0xd9b   :  { %2598 = vmatprep.subr.bf16.mxu1 %v2753_v0 }
 0xd9c   :  { %v1056_v51 = vld [vmem:[#allocation2 + $0x20] sm:$0xff] }
 0xe68   :  { %v801_v23 = vpop.f32.mrb[6].mxu1 }
 0xe69   :  { %v812_v24 = vadd.f32 %v801_v23, %v2857_v17  ;;  %v2392_v25 = vpop.f32.mrb[7].mxu1  ;;  %v805_v27 = vadd.f32 %v801_v23, %v732_v26 }
 0xe6a   :  { %v2178_v25 = vld [vmem:[%s3180_s2 + $0x38] sm:$0xff] }
 0xe6b   :  { %814 = vrot.lane.b32.xlu1 %v812_v24, %s2756_s21  ;;  %v2156_v28 = vmul.f32 -1.442695, %v805_v27  ;;  %v2177_v24 = vld [vmem:[%s3180_s2 + $0x30] sm:$0xff] }
 0xe6d   :  { %2687 = vpow2.f32 %v2156_v28 }
 0xe77   :  { %v2688_v9 = vpop.eup %2687 }
 0xe78   :  { %v809_v29 = vadd.f32 1.0, %v2688_v9  ;;  %v2181_v9 = vld [vmem:[%s3182_s4 + $0x1] ss:$0 sm:$0xff] }
 0xe7a   :  { %2689 = vrcp.f32 %v809_v29 }
 0xe84   :  { %v2690_v30 = vpop.eup %2689 }
 0xe85   :  { %v824_v38 = vsub.f32 1.0, %v2690_v30  ;;  %v830_v40 = vmul.f32 %v2690_v30, %v724_v22  ;;  %v2175_v22 = vld [vmem:[%s3180_s2 + $0x20] sm:$0xff] }
 0xe86   :  { %v3026_v23 = vpack.c.bf16 %v2176_v18, %v2175_v22 }
 0xedd   :  { %v815_v31 = vpop.permute.xlu1 %814 }
 0xede   :  { %v817_v32 = vmul.f32 %v2690_v30, %v815_v31 }
 0xee0   :  { %819 = vrot.lane.b32.xlu0 %v817_v32, %s2756_s21 }
 0xf52   :  { %v820_v15 = vpop.permute.xlu0 %819 }
 0xf53   :  { %v822_v33 = vadd.f32 %v820_v15, %v732_v26  ;;  %v3036_v26 = vpack.c.bf16 %v2178_v25, %v2177_v24 }
 0xf55   :  { %2691 = vtanh.f32 %v822_v33 }
 0xf5f   :  { %v2692_v37 = vpop.eup %2691 }
 0xf60   :  { %826 = vrot.lane.b32.xlu1 %v2692_v37, %s2757_s26 }
 0xfd2   :  { %v827_v39 = vpop.permute.xlu1 %826 }
 0xfd3   :  { %v829_v41 = vmul.f32 %v827_v39, %v824_v38 }
 0xfd5   :  { %v2980_v42 = vadd.f32 %v830_v40, %v829_v41 }
 0xfd7   :  { %833 = vrot.lane.b32.xlu0 %v2980_v42, %s2757_s26 }
0x1049   :  { %v834_v46 = vpop.permute.xlu0 %833 }
0x104a   :  { %837 = vst.msk [vmem:[#allocation2 + $0x28] sm:$0xff] %vm45_vm1, %v834_v46  ;;  %2402 = vmatmul.mubr.msk.f32.vlgmr.msra.gmra.mrb[12].mxu0 %vm45_vm1, %v834_v46 }
0x104b   :  { %2593 = vmatpush3.bf16.msra.mxu0 %v2590_v36  ;;  %2423 = vmatprep.mubr.msk.f32.mxu0 %vm45_vm1, %v1052_v47 }
0x104c   :  { %2595 = vmatprep.subr.bf16.mxu0 %v2594_v45 }
0x104f   :  { %2597 = vmatpush3.bf16.msra.mxu0 %v2594_v45 }
0x1050   :  { %2610 = vmatprep.subr.bf16.mxu0 %v2753_v0 }
0x1051   :  { %v1057_v52 = vld [vmem:[#allocation2 + $0x28] sm:$0xff] }
0x1052   :  { %2424 = vmatmul.mubr.msk.f32.vlgmr.msra.gmra.mrb[14].mxu0 %vm45_vm1, %v1053_v48 }
0x1053   :  { %2426 = vmatprep.mubr.msk.f32.mxu0 %vm45_vm1, %v1054_v49  ;;  %2612 = vmatpush3.bf16.msra.mxu0 %v3026_v23 }
0x1054   :  { %2613 = vmatprep.subr.bf16.mxu0 %v2753_v0 }
0x1056   :  { %2427 = vmatmul.mubr.msk.f32.gmra.mrb[16].mxu0 %vm45_vm1, %v1055_v50 }
0x1057   :  { %2429 = vmatprep.mubr.msk.f32.mxu0 %vm45_vm1, %v1056_v51  ;;  %2615 = vmatpush3.bf16.msra.mxu0 %v3036_v26  ;;  %v946_v51 = vld [vmem:[#allocation3 + $0x38] sm:$0xff] }
0x1058   :  { %2622 = vmatprep.subr.bf16.mxu0 %v2753_v0 }
0x105a   :  { %2430 = vmatmul.mubr.msk.f32.gmra.mrb[18].mxu0 %vm45_vm1, %v1057_v52 }
0x111d   :  { %v908_v53 = vpop.f32.mrb[12].mxu0 }
0x111e   :  { %v919_v54 = vadd.f32 %v908_v53, %v2857_v17  ;;  %v2403_v55 = vpop.f32.mrb[13].mxu0  ;;  %v912_v8 = vadd.f32 %v908_v53, %v839_v7 }
0x1120   :  { %921 = vrot.lane.b32.xlu1 %v919_v54, %s2756_s21  ;;  %v2158_v10 = vmul.f32 -1.442695, %v912_v8 }
0x1122   :  { %2693 = vpow2.f32 %v2158_v10 }
0x1125   :  { %v2425_v57 = vpop.f32.mrb[14].mxu0 }
0x1126   :  { %v1169_v58 = vadd.f32 %v2425_v57, %v3004_v56  ;;  %v1163_v59 = vpop.f32.mrb[15].mxu0 }
0x1127   :  { %v1164_v60 = vadd.f32 %v3004_v56, %v1163_v59 }
0x1128   :  { %1203 = vst.msk [vmem:[#allocation3 + $0x8] sm:$0xff] %vm175_vm2, %v1169_v58 }
0x1129   :  { %1202 = vst.msk [vmem:[#allocation3] sm:$0xff] %vm175_vm2, %v1164_v60  ;;  %v2428_v61 = vpop.f32.mrb[16].mxu0 }
0x112a   :  { %v1179_v62 = vadd.f32 %v2428_v61, %v3004_v56  ;;  %v1173_v63 = vpop.f32.mrb[17].mxu0 }
0x112b   :  { %v1174_v1 = vadd.f32 %v3004_v56, %v1173_v63 }
0x112c   :  { %1205 = vst.msk [vmem:[#allocation3 + $0x18] sm:$0xff] %vm175_vm2, %v1179_v62  ;;  %v2694_v11 = vpop.eup %2693 }
0x112d   :  { %1204 = vst.msk [vmem:[#allocation3 + $0x10] sm:$0xff] %vm175_vm2, %v1174_v1  ;;  %v2431_v2 = vpop.f32.mrb[18].mxu0  ;;  %v916_v12 = vadd.f32 1.0, %v2694_v11 }
0x112e   :  { %v1189_v3 = vadd.f32 %v2431_v2, %v3004_v56  ;;  %v1183_v5 = vpop.f32.mrb[19].mxu0 }
0x112f   :  { %v1184_v6 = vadd.f32 %v3004_v56, %v1183_v5  ;;  %2695 = vrcp.f32 %v916_v12 }
0x1130   :  { %1207 = vst.msk [vmem:[#allocation3 + $0x28] sm:$0xff] %vm175_vm2, %v1189_v3  ;;  %v1217_v39 = vld [vmem:[#allocation3] sm:$0xff] }
0x1131   :  { %1206 = vst.msk [vmem:[#allocation3 + $0x20] sm:$0xff] %vm175_vm2, %v1184_v6 }
0x1139   :  { %v2696_v13 = vpop.eup %2695 }
0x113a   :  { %v931_v27 = vsub.f32 1.0, %v2696_v13  ;;  %v937_v29 = vmul.f32 %v2696_v13, %v2980_v42 }
0x1192   :  { %v922_v14 = vpop.permute.xlu1 %921 }
0x1193   :  { %v924_v16 = vmul.f32 %v2696_v13, %v922_v14 }
0x1195   :  { %926 = vrot.lane.b32.xlu0 %v924_v16, %s2756_s21 }
0x1207   :  { %v927_v19 = vpop.permute.xlu0 %926 }
0x1208   :  { %v929_v20 = vadd.f32 %v927_v19, %v839_v7 }
0x120a   :  { %2697 = vtanh.f32 %v929_v20  ;;  %v1323_v20 = vld [vmem:[#allocation3 + $0x8] sm:$0xff] }
0x1214   :  { %v2698_v21 = vpop.eup %2697 }
0x1215   :  { %933 = vrot.lane.b32.xlu1 %v2698_v21, %s2757_s26 }
0x1219   :  { %1300 = vrot.lane.b32.xlu1 %v2181_v9, %s2756_s21 }
0x1287   :  { %v934_v28 = vpop.permute.xlu1 %933 }
0x1288   :  { %v936_v30 = vmul.f32 %v934_v28, %v931_v27 }
0x128a   :  { %v3045_v31 = vadd.f32 %v937_v29, %v936_v30 }
0x128b   :  { %v3065_v35 = vpop.permute.xlu1 %1300 }
0x128c   :  { %940 = vrot.lane.b32.xlu0 %v3045_v31, %s2757_s26 }
0x12fe   :  { %v941_v32 = vpop.permute.xlu0 %940 }
0x12ff   :  { %944 = vst.msk [vmem:[#allocation2 + $0x30] sm:$0xff] %vm45_vm1, %v941_v32  ;;  %2413 = vmatmul.mubr.msk.f32.vlgmr.msra.gmra.mrb[8].mxu1 %vm45_vm1, %v941_v32 }
0x1300   :  { %2600 = vmatpush3.bf16.msra.mxu1 %v3026_v23  ;;  %2443 = vmatprep.mubr.msk.f32.mxu1 %vm2754_vm0, %v2755_v4 }
0x1301   :  { %2601 = vmatprep.subr.bf16.mxu1 %v2753_v0 }
0x1304   :  { %2603 = vmatpush3.bf16.msra.mxu1 %v3036_v26 }
0x1305   :  { %2604 = vmatprep.subr.bf16.mxu1 %v2753_v0 }
0x1306   :  { %v1058_v15 = vld [vmem:[#allocation2 + $0x30] sm:$0xff] }
0x1307   :  { %2444 = vmatmul.mubr.f32.vlgmr.msra.gmra.mrb[10].mxu1 %v2755_v4  ;;  %2432 = vmatprep.mubr.msk.f32.mxu0 %vm45_vm1, %v1058_v15 }
0x1308   :  { %2606 = vmatpush3.bf16.msra.mxu1 %v3026_v23  ;;  %2454 = vmatprep.mubr.msk.f32.mxu1 %vm2754_vm0, %v2755_v4 }
0x1309   :  { %2607 = vmatprep.subr.bf16.mxu1 %v2753_v0 }
0x130c   :  { %2609 = vmatpush3.bf16.msra.mxu1 %v3036_v26 }
0x130d   :  { %2616 = vmatprep.subr.bf16.mxu1 %v2753_v0 }
0x13d2   :  { %v1015_v33 = vpop.f32.mrb[8].mxu1 }
0x13d3   :  { %v2414_v34 = vpop.f32.mrb[9].mxu1  ;;  %v1026_v50 = vadd.f32 %v1015_v33, %v2857_v17  ;;  %v1019_v52 = vadd.f32 %v1015_v33, %v946_v51 }
0x13d5   :  { %v2160_v53 = vmul.f32 -1.442695, %v1019_v52 }
0x13da   :  { %v1284_v36 = vpop.f32.mrb[10].mxu1 }
0x13db   :  { %v1303_v37 = vadd.f32 %v3065_v35, %v1284_v36  ;;  %v2445_v38 = vpop.f32.mrb[11].mxu1  ;;  %v1288_v40 = vadd.f32 %v1284_v36, %v1217_v39 }
0x13dd   :  { %1305 = vrot.lane.b32.xlu0 %v1303_v37, %s2756_s21  ;;  %v2180_v41 = vmul.f32 -1.442695, %v1288_v40 }
0x13df   :  { %2699 = vpow2.f32 %v2180_v41 }
0x13e9   :  { %v2700_v42 = vpop.eup %2699 }
0x13ea   :  { %v1292_v43 = vadd.f32 1.0, %v2700_v42 }
0x13ec   :  { %2701 = vrcp.f32 %v1292_v43  ;;  %v1426_v43 = vld [vmem:[#allocation3 + $0x10] sm:$0xff] }
0x13f6   :  { %v2702_v44 = vpop.eup %2701 }
0x13f7   :  { %v1315_v57 = vsub.f32 1.0, %v2702_v44  ;;  %v1321_v59 = vmul.f32 0.0, %v2702_v44 }
0x144f   :  { %v1306_v45 = vpop.permute.xlu0 %1305 }
0x1450   :  { %v1308_v46 = vmul.f32 %v2702_v44, %v1306_v45 }
0x1452   :  { %1310 = vrot.lane.b32.xlu1 %v1308_v46, %s2756_s21 }
0x14c4   :  { %v1311_v47 = vpop.permute.xlu1 %1310 }
0x14c5   :  { %v1313_v48 = vadd.f32 %v1311_v47, %v1217_v39 }
0x14c7   :  { %2703 = vtanh.f32 %v1313_v48 }
0x14c8   :  { %2705 = vpow2.f32 %v2160_v53 }
0x14d1   :  { %v2704_v49 = vpop.eup %2703 }
0x14d2   :  { %1317 = vrot.lane.b32.xlu0 %v2704_v49, %s2757_s26  ;;  %v2706_v54 = vpop.eup %2705 }
0x14d3   :  { %v1023_v55 = vadd.f32 1.0, %v2706_v54 }
0x14d5   :  { %2707 = vrcp.f32 %v1023_v55 }
0x14d6   :  { %1028 = vrot.lane.b32.xlu0 %v1026_v50, %s2756_s21 }
0x14df   :  { %v2708_v62 = vpop.eup %2707 }
0x14e0   :  { %v1038_v6 = vsub.f32 1.0, %v2708_v62  ;;  %v1044_v8 = vmul.f32 %v2708_v62, %v3045_v31 }
0x1544   :  { %v1318_v58 = vpop.permute.xlu0 %1317 }
0x1545   :  { %v1320_v60 = vmul.f32 %v1318_v58, %v1315_v57 }
0x1547   :  { %v1322_v61 = vadd.f32 %v1321_v59, %v1320_v60 }
0x1548   :  { %v1029_v63 = vpop.permute.xlu0 %1028 }
0x1549   :  { %v1031_v1 = vmul.f32 %v2708_v62, %v1029_v63  ;;  %1325 = vrot.lane.b32.xlu1 %v1322_v61, %s2757_s26 }
0x154b   :  { %1033 = vrot.lane.b32.xlu0 %v1031_v1, %s2756_s21  ;;  %v1529_v1 = vld [vmem:[#allocation3 + $0x18] sm:$0xff] }
0x15bb   :  { %v1326_v17 = vpop.permute.xlu1 %1325 }
0x15bc   :  { %2455 = vmatmul.mubr.msk.f32.vlgmr.msra.gmra.mrb[12].mxu1 %vm45_vm1, %v1326_v17 }
0x15bd   :  { %v1034_v2 = vpop.permute.xlu0 %1033  ;;  %2618 = vmatpush3.bf16.msra.mxu1 %v3026_v23  ;;  %2476 = vmatprep.mubr.msk.f32.mxu1 %vm2754_vm0, %v2755_v4 }
0x15be   :  { %v1036_v3 = vadd.f32 %v1034_v2, %v946_v51  ;;  %2619 = vmatprep.subr.bf16.mxu1 %v2753_v0 }
0x15c0   :  { %2709 = vtanh.f32 %v1036_v3 }
0x15c1   :  { %2621 = vmatpush3.bf16.msra.mxu1 %v3036_v26 }
0x15c2   :  { %2628 = vmatprep.subr.bf16.mxu1 %v2753_v0 }
0x15ca   :  { %v2710_v5 = vpop.eup %2709 }
0x15cb   :  { %1040 = vrot.lane.b32.xlu0 %v2710_v5, %s2757_s26 }
0x163d   :  { %v1041_v7 = vpop.permute.xlu0 %1040 }
0x163e   :  { %v1043_v10 = vmul.f32 %v1041_v7, %v1038_v6 }
0x1640   :  { %v1045_v11 = vadd.f32 %v1044_v8, %v1043_v10 }
0x1642   :  { %1047 = vrot.lane.b32.xlu0 %v1045_v11, %s2757_s26 }
0x168f   :  { %v1395_v12 = vpop.f32.mrb[12].mxu1 }
0x1690   :  { %v1406_v13 = vadd.f32 %v1395_v12, %v3065_v35  ;;  %v2456_v14 = vpop.f32.mrb[13].mxu1  ;;  %v1399_v21 = vadd.f32 %v1395_v12, %v1323_v20 }
0x1692   :  { %1408 = vrot.lane.b32.xlu1 %v1406_v13, %s2756_s21  ;;  %v2183_v22 = vmul.f32 -1.442695, %v1399_v21 }
0x1694   :  { %2711 = vpow2.f32 %v2183_v22 }
0x169e   :  { %v2712_v18 = vpop.eup %2711 }
0x169f   :  { %v1403_v24 = vadd.f32 1.0, %v2712_v18 }
0x16a1   :  { %2713 = vrcp.f32 %v1403_v24 }
0x16ab   :  { %v2714_v25 = vpop.eup %2713 }
0x16ac   :  { %v1418_v34 = vsub.f32 1.0, %v2714_v25  ;;  %v1424_v37 = vmul.f32 %v2714_v25, %v1322_v61 }
0x16b4   :  { %v1048_v16 = vpop.permute.xlu0 %1047 }
0x16b5   :  { %1051 = vst.msk [vmem:[#allocation2 + $0x38] sm:$0xff] %vm45_vm1, %v1048_v16 }
0x16bc   :  { %v1059_v19 = vld [vmem:[#allocation2 + $0x38] sm:$0xff] }
0x16bd   :  { %2433 = vmatmul.mubr.msk.f32.gmra.mrb[20].mxu0 %vm45_vm1, %v1059_v19 }
0x16be   :  { %2465 = vmatprep.mubr.msk.f32.mxu0 %vm2754_vm0, %v2755_v4 }
0x1704   :  { %v1409_v27 = vpop.permute.xlu1 %1408 }
0x1705   :  { %v1411_v28 = vmul.f32 %v2714_v25, %v1409_v27  ;;  %v1632_v25 = vld [vmem:[#allocation3 + $0x20] sm:$0xff] }
0x1707   :  { %1413 = vrot.lane.b32.xlu1 %v1411_v28, %s2756_s21 }
0x1779   :  { %v1414_v9 = vpop.permute.xlu1 %1413 }
0x177a   :  { %v1416_v29 = vadd.f32 %v1414_v9, %v1323_v20 }
0x177c   :  { %2715 = vtanh.f32 %v1416_v29 }
0x1786   :  { %v2716_v30 = vpop.eup %2715 }
0x1787   :  { %1420 = vrot.lane.b32.xlu1 %v2716_v30, %s2757_s26 }
0x1790   :  { %v2434_v31 = vpop.f32.mrb[20].mxu0 }
0x1791   :  { %v1199_v32 = vadd.f32 %v2434_v31, %v3004_v56  ;;  %v1193_v15 = vpop.f32.mrb[21].mxu0 }
0x1792   :  { %v1194_v33 = vadd.f32 %v3004_v56, %v1193_v15 }
0x1793   :  { %1209 = vst.msk [vmem:[#allocation3 + $0x38] sm:$0xff] %vm175_vm2, %v1199_v32 }
0x1794   :  { %1208 = vst.msk [vmem:[#allocation3 + $0x30] sm:$0xff] %vm175_vm2, %v1194_v33 }
0x17f9   :  { %v1421_v36 = vpop.permute.xlu1 %1420 }
0x17fa   :  { %v1423_v38 = vmul.f32 %v1421_v36, %v1418_v34 }
0x17fc   :  { %v1425_v39 = vadd.f32 %v1424_v37, %v1423_v38 }
0x17fe   :  { %1428 = vrot.lane.b32.xlu1 %v1425_v39, %s2757_s26 }
0x1870   :  { %v1429_v40 = vpop.permute.xlu1 %1428 }
0x1871   :  { %2466 = vmatmul.mubr.msk.f32.vlgmr.msra.gmra.mrb[22].mxu0 %vm45_vm1, %v1429_v40 }
0x1872   :  { %2624 = vmatpush3.bf16.msra.mxu0 %v3026_v23  ;;  %2487 = vmatprep.mubr.msk.f32.mxu0 %vm2754_vm0, %v2755_v4 }
0x1873   :  { %2625 = vmatprep.subr.bf16.mxu0 %v2753_v0 }
0x1876   :  { %2627 = vmatpush3.bf16.msra.mxu0 %v3036_v26 }
0x1877   :  { %2634 = vmatprep.subr.bf16.mxu0 %v2753_v0 }
0x1944   :  { %v1498_v56 = vpop.f32.mrb[22].mxu0 }
0x1945   :  { %v1509_v41 = vadd.f32 %v1498_v56, %v3065_v35  ;;  %v2467_v42 = vpop.f32.mrb[23].mxu0  ;;  %v1502_v44 = vadd.f32 %v1498_v56, %v1426_v43 }
0x1947   :  { %1511 = vrot.lane.b32.xlu0 %v1509_v41, %s2756_s21  ;;  %v2185_v45 = vmul.f32 -1.442695, %v1502_v44  ;;  %v1735_v44 = vld [vmem:[#allocation3 + $0x28] sm:$0xff] }
0x1949   :  { %2717 = vpow2.f32 %v2185_v45 }
0x1953   :  { %v2718_v46 = vpop.eup %2717 }
0x1954   :  { %v1506_v47 = vadd.f32 1.0, %v2718_v46 }
0x1956   :  { %2719 = vrcp.f32 %v1506_v47 }
0x1960   :  { %v2720_v48 = vpop.eup %2719 }
0x1961   :  { %v1521_v54 = vsub.f32 1.0, %v2720_v48  ;;  %v1527_v57 = vmul.f32 %v2720_v48, %v1425_v39 }
0x19b9   :  { %v1512_v49 = vpop.permute.xlu0 %1511 }
0x19ba   :  { %v1514_v50 = vmul.f32 %v2720_v48, %v1512_v49 }
0x19bc   :  { %1516 = vrot.lane.b32.xlu1 %v1514_v50, %s2756_s21 }
0x1a2e   :  { %v1517_v51 = vpop.permute.xlu1 %1516 }
0x1a2f   :  { %v1519_v52 = vadd.f32 %v1517_v51, %v1426_v43 }
0x1a31   :  { %2721 = vtanh.f32 %v1519_v52 }
0x1a3b   :  { %v2722_v53 = vpop.eup %2721 }
0x1a3c   :  { %1523 = vrot.lane.b32.xlu0 %v2722_v53, %s2757_s26 }
0x1aae   :  { %v1524_v55 = vpop.permute.xlu0 %1523 }
0x1aaf   :  { %v1526_v58 = vmul.f32 %v1524_v55, %v1521_v54 }
0x1ab1   :  { %v1528_v59 = vadd.f32 %v1527_v57, %v1526_v58 }
0x1ab3   :  { %1531 = vrot.lane.b32.xlu1 %v1528_v59, %s2757_s26 }
0x1b25   :  { %v1532_v60 = vpop.permute.xlu1 %1531 }
0x1b26   :  { %2477 = vmatmul.mubr.msk.f32.vlgmr.msra.gmra.mrb[14].mxu1 %vm45_vm1, %v1532_v60 }
0x1b27   :  { %2630 = vmatpush3.bf16.msra.mxu1 %v3026_v23  ;;  %2498 = vmatprep.mubr.msk.f32.mxu1 %vm2754_vm0, %v2755_v4 }
0x1b28   :  { %2631 = vmatprep.subr.bf16.mxu1 %v2753_v0 }
0x1b2b   :  { %2633 = vmatpush3.bf16.msra.mxu1 %v3036_v26 }
0x1b2c   :  { %2640 = vmatprep.subr.bf16.mxu1 %v2753_v0 }
0x1bf9   :  { %v1601_v61 = vpop.f32.mrb[14].mxu1 }
0x1bfa   :  { %v1612_v62 = vadd.f32 %v1601_v61, %v3065_v35  ;;  %v2478_v63 = vpop.f32.mrb[15].mxu1  ;;  %v1605_v17 = vadd.f32 %v1601_v61, %v1529_v1 }
0x1bfb   :  { %v1838_v63 = vld [vmem:[#allocation3 + $0x30] sm:$0xff] }
0x1bfc   :  { %1614 = vrot.lane.b32.xlu0 %v1612_v62, %s2756_s21  ;;  %v2187_v2 = vmul.f32 -1.442695, %v1605_v17 }
0x1bfe   :  { %2723 = vpow2.f32 %v2187_v2 }
0x1c08   :  { %v2724_v3 = vpop.eup %2723 }
0x1c09   :  { %v1609_v5 = vadd.f32 1.0, %v2724_v3 }
0x1c0b   :  { %2725 = vrcp.f32 %v1609_v5 }
0x1c15   :  { %v2726_v6 = vpop.eup %2725 }
0x1c16   :  { %v1624_v13 = vsub.f32 1.0, %v2726_v6  ;;  %v1630_v16 = vmul.f32 %v2726_v6, %v1528_v59 }
0x1c6e   :  { %v1615_v7 = vpop.permute.xlu0 %1614 }
0x1c6f   :  { %v1617_v8 = vmul.f32 %v2726_v6, %v1615_v7 }
0x1c71   :  { %1619 = vrot.lane.b32.xlu1 %v1617_v8, %s2756_s21 }
0x1ce3   :  { %v1620_v10 = vpop.permute.xlu1 %1619 }
0x1ce4   :  { %v1622_v11 = vadd.f32 %v1620_v10, %v1529_v1 }
0x1ce6   :  { %2727 = vtanh.f32 %v1622_v11 }
0x1cf0   :  { %v2728_v12 = vpop.eup %2727 }
0x1cf1   :  { %1626 = vrot.lane.b32.xlu0 %v2728_v12, %s2757_s26 }
0x1d63   :  { %v1627_v14 = vpop.permute.xlu0 %1626 }
0x1d64   :  { %v1629_v19 = vmul.f32 %v1627_v14, %v1624_v13 }
0x1d66   :  { %v1631_v20 = vadd.f32 %v1630_v16, %v1629_v19 }
0x1d68   :  { %1634 = vrot.lane.b32.xlu1 %v1631_v20, %s2757_s26 }
0x1dda   :  { %v1635_v21 = vpop.permute.xlu1 %1634 }
0x1ddb   :  { %2488 = vmatmul.mubr.msk.f32.vlgmr.msra.gmra.mrb[24].mxu0 %vm45_vm1, %v1635_v21 }
0x1ddc   :  { %2636 = vmatpush3.bf16.msra.mxu0 %v3026_v23  ;;  %2509 = vmatprep.mubr.msk.f32.mxu0 %vm2754_vm0, %v2755_v4 }
0x1ddd   :  { %2637 = vmatprep.subr.bf16.mxu0 %v2753_v0 }
0x1de0   :  { %2639 = vmatpush3.bf16.msra.mxu0 %v3036_v26 }
0x1de1   :  { %2646 = vmatprep.subr.bf16.mxu0 %v2753_v0 }
0x1eae   :  { %v1704_v22 = vpop.f32.mrb[24].mxu0 }
0x1eaf   :  { %v1715_v18 = vadd.f32 %v1704_v22, %v3065_v35  ;;  %v2489_v24 = vpop.f32.mrb[25].mxu0  ;;  %v1708_v27 = vadd.f32 %v1704_v22, %v1632_v25 }
0x1eb1   :  { %1717 = vrot.lane.b32.xlu0 %v1715_v18, %s2756_s21  ;;  %v2189_v28 = vmul.f32 -1.442695, %v1708_v27  ;;  %v1941_v18 = vld [vmem:[#allocation3 + $0x38] sm:$0xff] }
0x1eb3   :  { %2729 = vpow2.f32 %v2189_v28 }
0x1ebd   :  { %v2730_v9 = vpop.eup %2729 }
0x1ebe   :  { %v1712_v29 = vadd.f32 1.0, %v2730_v9 }
0x1ec0   :  { %2731 = vrcp.f32 %v1712_v29 }
0x1eca   :  { %v2732_v30 = vpop.eup %2731 }
0x1ecb   :  { %v1727_v36 = vsub.f32 1.0, %v2732_v30  ;;  %v1733_v38 = vmul.f32 %v2732_v30, %v1631_v20 }
0x1f23   :  { %v1718_v31 = vpop.permute.xlu0 %1717 }
0x1f24   :  { %v1720_v32 = vmul.f32 %v2732_v30, %v1718_v31 }
0x1f26   :  { %1722 = vrot.lane.b32.xlu1 %v1720_v32, %s2756_s21 }
0x1f98   :  { %v1723_v15 = vpop.permute.xlu1 %1722 }
0x1f99   :  { %v1725_v33 = vadd.f32 %v1723_v15, %v1632_v25  ;;  %v2045_v15 = vld [vmem:[%s3184_s5 + $0x8] sm:$0xff] }
0x1f9b   :  { %2733 = vtanh.f32 %v1725_v33  ;;  %v2046_v33 = vld [vmem:[%s3184_s5 + $0x10] sm:$0xff] }
0x1fa5   :  { %v2734_v34 = vpop.eup %2733 }
0x1fa6   :  { %1729 = vrot.lane.b32.xlu0 %v2734_v34, %s2757_s26 }
0x2018   :  { %v1730_v37 = vpop.permute.xlu0 %1729 }
0x2019   :  { %v1732_v39 = vmul.f32 %v1730_v37, %v1727_v36  ;;  %v2047_v36 = vld [vmem:[%s3184_s5 + $0x18] sm:$0xff] }
0x201a   :  { %v2650_v37 = vpack.c.bf16 %v2047_v36, %v2046_v33 }
0x201b   :  { %v1734_v40 = vadd.f32 %v1733_v38, %v1732_v39 }
0x201d   :  { %1737 = vrot.lane.b32.xlu1 %v1734_v40, %s2757_s26 }
0x208f   :  { %v1738_v56 = vpop.permute.xlu1 %1737 }
0x2090   :  { %2499 = vmatmul.mubr.msk.f32.vlgmr.msra.gmra.mrb[16].mxu1 %vm45_vm1, %v1738_v56 }
0x2091   :  { %2642 = vmatpush3.bf16.msra.mxu1 %v3026_v23  ;;  %2520 = vmatprep.mubr.msk.f32.mxu1 %vm2754_vm0, %v2755_v4 }
0x2092   :  { %2643 = vmatprep.subr.bf16.mxu1 %v2753_v0 }
0x2095   :  { %2645 = vmatpush3.bf16.msra.mxu1 %v3036_v26 }
0x2163   :  { %v1807_v41 = vpop.f32.mrb[16].mxu1 }
0x2164   :  { %v1818_v42 = vadd.f32 %v1807_v41, %v3065_v35  ;;  %v2500_v43 = vpop.f32.mrb[17].mxu1  ;;  %v1811_v45 = vadd.f32 %v1807_v41, %v1735_v44 }
0x2166   :  { %1820 = vrot.lane.b32.xlu0 %v1818_v42, %s2756_s21  ;;  %v2191_v46 = vmul.f32 -1.442695, %v1811_v45 }
0x2168   :  { %2735 = vpow2.f32 %v2191_v46 }
0x2172   :  { %v2736_v47 = vpop.eup %2735 }
0x2173   :  { %v1815_v48 = vadd.f32 1.0, %v2736_v47 }
0x2175   :  { %2737 = vrcp.f32 %v1815_v48 }
0x217f   :  { %v2738_v23 = vpop.eup %2737 }
0x2180   :  { %v1830_v53 = vsub.f32 1.0, %v2738_v23  ;;  %v1836_v55 = vmul.f32 %v2738_v23, %v1734_v40 }
0x21d8   :  { %v1821_v49 = vpop.permute.xlu0 %1820 }
0x21d9   :  { %v1823_v50 = vmul.f32 %v2738_v23, %v1821_v49 }
0x21db   :  { %1825 = vrot.lane.b32.xlu1 %v1823_v50, %s2756_s21 }
0x224d   :  { %v1826_v51 = vpop.permute.xlu1 %1825 }
0x224e   :  { %v1828_v26 = vadd.f32 %v1826_v51, %v1735_v44  ;;  %v2196_v44 = vld [vmem:[%s3185_s6] ss:$0 sm:$0xff] }
0x2250   :  { %2739 = vtanh.f32 %v1828_v26 }
0x225a   :  { %v2740_v52 = vpop.eup %2739 }
0x225b   :  { %1832 = vrot.lane.b32.xlu0 %v2740_v52, %s2757_s26 }
0x22cd   :  { %v1833_v54 = vpop.permute.xlu0 %1832 }
0x22ce   :  { %v1835_v57 = vmul.f32 %v1833_v54, %v1830_v53 }
0x22d0   :  { %v1837_v58 = vadd.f32 %v1836_v55, %v1835_v57 }
0x22d2   :  { %1840 = vrot.lane.b32.xlu1 %v1837_v58, %s2757_s26 }
0x2344   :  { %v1841_v59 = vpop.permute.xlu1 %1840 }
0x2345   :  { %2510 = vmatmul.mubr.msk.f32.vlgmr.msra.gmra.mrb[26].mxu0 %vm45_vm1, %v1841_v59 }
0x2346   :  { %2531 = vmatprep.mubr.msk.f32.mxu0 %vm2754_vm0, %v2755_v4 }
0x2418   :  { %v1910_v60 = vpop.f32.mrb[26].mxu0 }
0x2419   :  { %v1921_v61 = vadd.f32 %v1910_v60, %v3065_v35  ;;  %v2511_v62 = vpop.f32.mrb[27].mxu0  ;;  %v1914_v1 = vadd.f32 %v1910_v60, %v1838_v63 }
0x241b   :  { %1923 = vrot.lane.b32.xlu0 %v1921_v61, %s2756_s21  ;;  %v2193_v17 = vmul.f32 -1.442695, %v1914_v1 }
0x241d   :  { %2741 = vpow2.f32 %v2193_v17 }
0x2427   :  { %v2742_v2 = vpop.eup %2741 }
0x2428   :  { %v1918_v3 = vadd.f32 1.0, %v2742_v2 }
0x242a   :  { %2743 = vrcp.f32 %v1918_v3 }
0x2434   :  { %v2744_v5 = vpop.eup %2743 }
0x2435   :  { %v1933_v11 = vsub.f32 1.0, %v2744_v5  ;;  %v1939_v13 = vmul.f32 %v2744_v5, %v1837_v58 }
0x248d   :  { %v1924_v6 = vpop.permute.xlu0 %1923 }
0x248e   :  { %v1926_v7 = vmul.f32 %v2744_v5, %v1924_v6 }
0x2490   :  { %1928 = vrot.lane.b32.xlu1 %v1926_v7, %s2756_s21 }
0x2502   :  { %v1929_v8 = vpop.permute.xlu1 %1928 }
0x2503   :  { %v1931_v4 = vadd.f32 %v1929_v8, %v1838_v63 }
0x2505   :  { %2745 = vtanh.f32 %v1931_v4 }
0x250f   :  { %v2746_v10 = vpop.eup %2745 }
0x2510   :  { %1935 = vrot.lane.b32.xlu0 %v2746_v10, %s2757_s26 }
0x2582   :  { %v1936_v12 = vpop.permute.xlu0 %1935 }
0x2583   :  { %v1938_v14 = vmul.f32 %v1936_v12, %v1933_v11 }
0x2585   :  { %v1940_v16 = vadd.f32 %v1939_v13, %v1938_v14 }
0x2587   :  { %1943 = vrot.lane.b32.xlu1 %v1940_v16, %s2757_s26 }
0x25f9   :  { %v1944_v19 = vpop.permute.xlu1 %1943 }
0x25fa   :  { %2521 = vmatmul.mubr.msk.f32.vlgmr.msra.gmra.mrb[18].mxu1 %vm45_vm1, %v1944_v19 }
0x26cd   :  { %v2013_v20 = vpop.f32.mrb[18].mxu1 }
0x26ce   :  { %v2024_v21 = vadd.f32 %v2013_v20, %v3065_v35  ;;  %v2522_v22 = vpop.f32.mrb[19].mxu1  ;;  %v2017_v24 = vadd.f32 %v2013_v20, %v1941_v18  ;;  %v2044_v35 = vld [vmem:[%s3184_s5] sm:$0xff] }
0x26cf   :  { %v2647_v34 = vpack.c.bf16 %v2045_v15, %v2044_v35 }
0x26d0   :  { %2026 = vrot.lane.b32.xlu0 %v2024_v21, %s2756_s21  ;;  %v2195_v25 = vmul.f32 -1.442695, %v2017_v24 }
0x26d1   :  { %2648 = vmatpush3.bf16.msra.mxu0 %v2647_v34 }
0x26d2   :  { %2747 = vpow2.f32 %v2195_v25  ;;  %2649 = vmatprep.subr.bf16.mxu0 %v2753_v0 }
0x26d5   :  { %2651 = vmatpush3.bf16.msra.mxu0 %v2650_v37 }
0x26dc   :  { %v2748_v27 = vpop.eup %2747 }
0x26dd   :  { %v2021_v28 = vadd.f32 1.0, %v2748_v27 }
0x26df   :  { %2749 = vrcp.f32 %v2021_v28 }
0x26e9   :  { %v2750_v9 = vpop.eup %2749 }
0x26ea   :  { %v2036_v39 = vsub.f32 1.0, %v2750_v9  ;;  %v2042_v56 = vmul.f32 %v2750_v9, %v1940_v16 }
0x2742   :  { %v2027_v29 = vpop.permute.xlu0 %2026 }
0x2743   :  { %v2029_v30 = vmul.f32 %v2750_v9, %v2027_v29 }
0x2745   :  { %2031 = vrot.lane.b32.xlu1 %v2029_v30, %s2756_s21 }
0x27b7   :  { %v2032_v31 = vpop.permute.xlu1 %2031 }
0x27b8   :  { %v2034_v32 = vadd.f32 %v2032_v31, %v1941_v18 }
0x27ba   :  { %2751 = vtanh.f32 %v2034_v32 }
0x27c4   :  { %v2752_v38 = vpop.eup %2751 }
0x27c5   :  { %2038 = vrot.lane.b32.xlu0 %v2752_v38, %s2757_s26 }
0x2837   :  { %v2039_v40 = vpop.permute.xlu0 %2038 }
0x2838   :  { %v2041_v41 = vmul.f32 %v2039_v40, %v2036_v39 }
0x283a   :  { %v2043_v42 = vadd.f32 %v2042_v56, %v2041_v41 }
0x283c   :  { %2056 = vrot.lane.b32.xlu1 %v2043_v42, %s2757_s26 }
0x28ae   :  { %v2057_v43 = vpop.permute.xlu1 %2056 }
0x28af   :  { %2532 = vmatmul.mubr.msk.f32.vlgmr.msra.gmra.mrb[28].mxu0 %vm45_vm1, %v2057_v43 }
0x2982   :  { %v2126_v45 = vpop.f32.mrb[28].mxu0 }
0x2983   :  { %v2127_v0 = vadd.f32 %v2196_v44, %v2126_v45  ;;  %v2533_v46 = vpop.f32.mrb[29].mxu0 }
0x2985   :  { %2131 = vst.msk [vmem:[%s3186_s7] sm:$0xff] %vm2130_vm3, %v2127_v0 }

</bundles_post_ra>
